<compile_context>
chip_gen: v7x
topology: tpu7x:2x2x1
jax: 0.10.0
libtpu: 0.0.40
codegen_flags: <defaults>
</compile_context>

<pallas_src>
import functools

import jax
import jax.numpy as jnp
from jax.experimental import pallas as pl
from jax.experimental.pallas import tpu as pltpu

CHAR_EMB_DIM = 16
KERNEL_SIZES = (1, 2, 3, 4, 5, 6, 7)
LAYER_SIZES = (8, 8, 16, 32, 64, 128, 256)
OUTPUT_SIZE = sum(LAYER_SIZES)  # 512
K_MAX = max(KERNEL_SIZES)       # 7
# CUM_CHANNELS[m] = number of output channels covered by convs with kernel <= m
CUM_CHANNELS = tuple(sum(LAYER_SIZES[:m]) for m in range(len(LAYER_SIZES) + 1))


def _round_up(x, m):
    return (x + m - 1) // m * m


def charcnn_kernel(emb_ref, w_ref, b_ref, out_ref, *, word_len, emb_dim):
    """Fused Conv1d x7 + ReLU + global max-pool + concat.

    emb_ref : (Nb, W*E)        bf16  -- block of Nb words, (char, emb) on lanes
    w_ref   : (K_MAX*E, 512)   bf16  -- all conv weights packed column-wise
    b_ref   : (1, 512)         f32   -- all conv biases concatenated
    out_ref : (Nb, 512)        f32
    """
    nb = out_ref.shape[0]
    n_out = out_ref.shape[1]

    emb = emb_ref[...]                                   # (Nb, W*E) bf16
    w = w_ref[...]                                       # (K_MAX*E, 512) bf16
    chan = jax.lax.broadcasted_iota(jnp.int32, (nb, n_out), 1)

    pooled = jnp.full((nb, n_out), -jnp.inf, jnp.float32)
    for t in range(word_len):
        # Number of convs with a valid output at position t (kernel size <= m).
        m = min(K_MAX, word_len - t)
        win = emb[:, t * emb_dim:(t + m) * emb_dim]      # (Nb, m*E)
        val = jnp.dot(win, w[:m * emb_dim, :],
                      preferred_element_type=jnp.float32)  # (Nb, 512)
        if m < K_MAX:
            # Channels of convs with kernel size > m have no valid window at
            # this position -> exclude them from the max.
            val = jnp.where(chan < CUM_CHANNELS[m], val, -jnp.inf)
        pooled = jnp.maximum(pooled, val)

    # Bias once after the max (max_t(v)+b == max_t(v+b)), ReLU fused, single
    # lane-dense 512-wide store.
    out_ref[...] = jnp.maximum(pooled + b_ref[...], 0.0).astype(out_ref.dtype)


def pack_params(conv_weights, conv_biases):
    """Pack per-conv flat weights (k*E, o) / biases (1, o) into one slab.

    Returns:
      w_big : (K_MAX*E, 512) bf16 -- conv i occupies rows [0:k_i*E] of its
                                      column block, zero-padded below.
      b_all : (1, 512)       f32
    """
    E = CHAR_EMB_DIM
    w_big = jnp.zeros((K_MAX * E, OUTPUT_SIZE), jnp.float32)
    b_all = jnp.zeros((1, OUTPUT_SIZE), jnp.float32)
    off = 0
    for (k, o), wf, b in zip(zip(KERNEL_SIZES, LAYER_SIZES),
                             conv_weights, conv_biases):
        w_big = w_big.at[:k * E, off:off + o].set(wf)
        b_all = b_all.at[:, off:off + o].set(b.reshape(1, o))
        off += o
    return w_big.astype(jnp.bfloat16), b_all


def charcnn_forward(x, emb_table, w_big, bias, *, block_n=256):
    """x: (B, S, W) int32 char ids.  Returns (B, S, OUTPUT_SIZE) f32."""
    B, S, W = x.shape
    E = emb_table.shape[1]
    N = B * S

    # Big words-per-block tiles; pad the word axis instead of asserting
    # divisibility.  Keep block_n a multiple of 16 (bf16 sublane packing);
    # don't over-pad tiny inputs.
    block_n = min(block_n, _round_up(N, 16))
    n_pad = _round_up(N, block_n)

    ids = x.reshape(N, W)
    if n_pad != N:
        ids = jnp.pad(ids, ((0, n_pad - N), (0, 0)))

    # Embedding gather in bf16 (halves the HBM round trip of the slab).
    emb = jnp.take(emb_table.astype(jnp.bfloat16), ids, axis=0)  # (Npad, W, E)
    emb2d = emb.reshape(n_pad, W * E)

    kernel = functools.partial(charcnn_kernel, word_len=W, emb_dim=E)
    out = pl.pallas_call(
        kernel,
        out_shape=jax.ShapeDtypeStruct((n_pad, OUTPUT_SIZE), jnp.float32),
        grid=(n_pad // block_n,),
        in_specs=[
            pl.BlockSpec((block_n, W * E), lambda i: (i, 0)),
            pl.BlockSpec(w_big.shape, lambda i: (0, 0)),
            pl.BlockSpec(bias.shape, lambda i: (0, 0)),
        ],
        out_specs=pl.BlockSpec((block_n, OUTPUT_SIZE), lambda i: (i, 0)),
        compiler_params=pltpu.CompilerParams(
            dimension_semantics=("parallel",)),
    )(emb2d, w_big, bias)
    return out[:N].reshape(B, S, OUTPUT_SIZE)


def charcnn_reference(x, emb_table, conv_weights, conv_biases):
    """Pure-JAX reference with the same bf16 input quantization, f32 math."""
    B, S, W = x.shape
    E = emb_table.shape[1]
    N = B * S
    emb = jnp.take(emb_table.astype(jnp.bfloat16), x.reshape(N, W), axis=0)
    outs = []
    for (k, o), wf, b in zip(zip(KERNEL_SIZES, LAYER_SIZES),
                             conv_weights, conv_biases):
        wq = wf.astype(jnp.bfloat16)
        t_len = W - k + 1
        vals = []
        for t in range(t_len):
            win = emb[:, t:t + k, :].reshape(N, k * E)
            vals.append(jnp.dot(win, wq,
                                preferred_element_type=jnp.float32) + b)
        v = jnp.stack(vals, axis=1)                      # (N, T, o)
        outs.append(jax.nn.relu(v).max(axis=1))          # (N, o)
    return jnp.concatenate(outs, axis=1).reshape(B, S, OUTPUT_SIZE)


if __name__ == "__main__":
    B, S, W = 2, 8, 16  # batch, max_seq_len, max_word_len

    key = jax.random.PRNGKey(0)
    n_convs = len(KERNEL_SIZES)
    keys = jax.random.split(key, 2 + 2 * n_convs)

    # Deterministic synthetic parameters (shapes match the module's __init__;
    # conv weights are stored directly in the flat (k*E, o) matmul layout).
    emb_table = 0.1 * jax.random.normal(keys[0], (256, CHAR_EMB_DIM),
                                        jnp.float32)
    conv_weights = []
    conv_biases = []
    for i, (k, o) in enumerate(zip(KERNEL_SIZES, LAYER_SIZES)):
        fan_in = k * CHAR_EMB_DIM
        conv_weights.append(
            jax.random.normal(keys[1 + i], (fan_in, o), jnp.float32)
            / jnp.sqrt(jnp.float32(fan_in)))
        conv_biases.append(
            0.01 * jax.random.normal(keys[1 + n_convs + i], (1, o),
                                     jnp.float32))

    x = jax.random.randint(keys[-1], (B, S, W), 0, 256, dtype=jnp.int32)

    w_big, bias = pack_params(conv_weights, conv_biases)

    out = charcnn_forward(x, emb_table, w_big, bias)
    out = jax.block_until_ready(out)

    ref = charcnn_reference(x, emb_table, conv_weights, conv_biases)
    ref = jax.block_until_ready(ref)

    assert out.shape == (B, S, OUTPUT_SIZE), out.shape
    max_err = float(jnp.max(jnp.abs(out - ref)))
    assert max_err < 1e-3, f"mismatch vs reference: {max_err}"
    print("KERNEL_OK")
</pallas_src>

<mosaic_0001>
module attributes {stable_mosaic.version = 11 : i64} {
  func.func @charcnn_kernel(%arg0: i32, %arg1: memref<16x256xbf16, #tpu.memory_space<vmem>>, %arg2: memref<112x512xbf16, #tpu.memory_space<vmem>>, %arg3: memref<1x512xf32, #tpu.memory_space<vmem>>, %arg4: memref<16x512xf32, #tpu.memory_space<vmem>>) attributes {dimension_semantics = [#tpu.dimension_semantics<parallel>], iteration_bounds = array<i64: 1>, scalar_prefetch = 0 : i64, scratch_operands = 0 : i64, tpu.core_type = #tpu.core_type<tc>, window_params = [{transform_indices = @transform_0, window_bounds = array<i64: 16, 256>}, {pipeline_mode = #tpu.pipeline_mode<synchronous>, transform_indices = @transform_1, window_bounds = array<i64: 112, 512>}, {pipeline_mode = #tpu.pipeline_mode<synchronous>, transform_indices = @transform_2, window_bounds = array<i64: 1, 512>}, {transform_indices = @transform_3, window_bounds = array<i64: 16, 512>}]} {
    %c0 = arith.constant 0 : index
    %c0_0 = arith.constant 0 : index
    %0 = vector.load %arg1[%c0, %c0_0] : memref<16x256xbf16, #tpu.memory_space<vmem>>, vector<16x256xbf16>
    %c0_1 = arith.constant 0 : index
    %c0_2 = arith.constant 0 : index
    %1 = vector.load %arg2[%c0_1, %c0_2] : memref<112x512xbf16, #tpu.memory_space<vmem>>, vector<112x512xbf16>
    %2 = tpu.iota {dimensions = array<i32: 1>} : vector<16x512xi32>
    %cst = arith.constant 0xFF800000 : f32
    %3 = vector.broadcast %cst : f32 to vector<16x512xf32>
    %4 = vector.extract_strided_slice %0 {offsets = [0, 0], sizes = [16, 112], strides = [1, 1]} : vector<16x256xbf16> to vector<16x112xbf16>
    %cst_3 = arith.constant dense<0.000000e+00> : vector<16x512xf32>
    %5 = tpu.matmul %4, %1, %cst_3 {dimension_numbers = #tpu.dot_dimension_numbers<[1], [0], [0], [1], [0, 0, 1, 1], [], []>} : vector<16x112xbf16>, vector<112x512xbf16>, vector<16x512xf32> -> vector<16x512xf32>
    %6 = arith.maximumf %3, %5 : vector<16x512xf32>
    %7 = vector.extract_strided_slice %0 {offsets = [0, 16], sizes = [16, 112], strides = [1, 1]} : vector<16x256xbf16> to vector<16x112xbf16>
    %cst_4 = arith.constant dense<0.000000e+00> : vector<16x512xf32>
    %8 = tpu.matmul %7, %1, %cst_4 {dimension_numbers = #tpu.dot_dimension_numbers<[1], [0], [0], [1], [0, 0, 1, 1], [], []>} : vector<16x112xbf16>, vector<112x512xbf16>, vector<16x512xf32> -> vector<16x512xf32>
    %9 = arith.maximumf %6, %8 : vector<16x512xf32>
    %10 = vector.extract_strided_slice %0 {offsets = [0, 32], sizes = [16, 112], strides = [1, 1]} : vector<16x256xbf16> to vector<16x112xbf16>
    %cst_5 = arith.constant dense<0.000000e+00> : vector<16x512xf32>
    %11 = tpu.matmul %10, %1, %cst_5 {dimension_numbers = #tpu.dot_dimension_numbers<[1], [0], [0], [1], [0, 0, 1, 1], [], []>} : vector<16x112xbf16>, vector<112x512xbf16>, vector<16x512xf32> -> vector<16x512xf32>
    %12 = arith.maximumf %9, %11 : vector<16x512xf32>
    %13 = vector.extract_strided_slice %0 {offsets = [0, 48], sizes = [16, 112], strides = [1, 1]} : vector<16x256xbf16> to vector<16x112xbf16>
    %cst_6 = arith.constant dense<0.000000e+00> : vector<16x512xf32>
    %14 = tpu.matmul %13, %1, %cst_6 {dimension_numbers = #tpu.dot_dimension_numbers<[1], [0], [0], [1], [0, 0, 1, 1], [], []>} : vector<16x112xbf16>, vector<112x512xbf16>, vector<16x512xf32> -> vector<16x512xf32>
    %15 = arith.maximumf %12, %14 : vector<16x512xf32>
    %16 = vector.extract_strided_slice %0 {offsets = [0, 64], sizes = [16, 112], strides = [1, 1]} : vector<16x256xbf16> to vector<16x112xbf16>
    %cst_7 = arith.constant dense<0.000000e+00> : vector<16x512xf32>
    %17 = tpu.matmul %16, %1, %cst_7 {dimension_numbers = #tpu.dot_dimension_numbers<[1], [0], [0], [1], [0, 0, 1, 1], [], []>} : vector<16x112xbf16>, vector<112x512xbf16>, vector<16x512xf32> -> vector<16x512xf32>
    %18 = arith.maximumf %15, %17 : vector<16x512xf32>
    %19 = vector.extract_strided_slice %0 {offsets = [0, 80], sizes = [16, 112], strides = [1, 1]} : vector<16x256xbf16> to vector<16x112xbf16>
    %cst_8 = arith.constant dense<0.000000e+00> : vector<16x512xf32>
    %20 = tpu.matmul %19, %1, %cst_8 {dimension_numbers = #tpu.dot_dimension_numbers<[1], [0], [0], [1], [0, 0, 1, 1], [], []>} : vector<16x112xbf16>, vector<112x512xbf16>, vector<16x512xf32> -> vector<16x512xf32>
    %21 = arith.maximumf %18, %20 : vector<16x512xf32>
    %22 = vector.extract_strided_slice %0 {offsets = [0, 96], sizes = [16, 112], strides = [1, 1]} : vector<16x256xbf16> to vector<16x112xbf16>
    %cst_9 = arith.constant dense<0.000000e+00> : vector<16x512xf32>
    %23 = tpu.matmul %22, %1, %cst_9 {dimension_numbers = #tpu.dot_dimension_numbers<[1], [0], [0], [1], [0, 0, 1, 1], [], []>} : vector<16x112xbf16>, vector<112x512xbf16>, vector<16x512xf32> -> vector<16x512xf32>
    %24 = arith.maximumf %21, %23 : vector<16x512xf32>
    %25 = vector.extract_strided_slice %0 {offsets = [0, 112], sizes = [16, 112], strides = [1, 1]} : vector<16x256xbf16> to vector<16x112xbf16>
    %cst_10 = arith.constant dense<0.000000e+00> : vector<16x512xf32>
    %26 = tpu.matmul %25, %1, %cst_10 {dimension_numbers = #tpu.dot_dimension_numbers<[1], [0], [0], [1], [0, 0, 1, 1], [], []>} : vector<16x112xbf16>, vector<112x512xbf16>, vector<16x512xf32> -> vector<16x512xf32>
    %27 = arith.maximumf %24, %26 : vector<16x512xf32>
    %28 = vector.extract_strided_slice %0 {offsets = [0, 128], sizes = [16, 112], strides = [1, 1]} : vector<16x256xbf16> to vector<16x112xbf16>
    %cst_11 = arith.constant dense<0.000000e+00> : vector<16x512xf32>
    %29 = tpu.matmul %28, %1, %cst_11 {dimension_numbers = #tpu.dot_dimension_numbers<[1], [0], [0], [1], [0, 0, 1, 1], [], []>} : vector<16x112xbf16>, vector<112x512xbf16>, vector<16x512xf32> -> vector<16x512xf32>
    %30 = arith.maximumf %27, %29 : vector<16x512xf32>
    %31 = vector.extract_strided_slice %0 {offsets = [0, 144], sizes = [16, 112], strides = [1, 1]} : vector<16x256xbf16> to vector<16x112xbf16>
    %cst_12 = arith.constant dense<0.000000e+00> : vector<16x512xf32>
    %32 = tpu.matmul %31, %1, %cst_12 {dimension_numbers = #tpu.dot_dimension_numbers<[1], [0], [0], [1], [0, 0, 1, 1], [], []>} : vector<16x112xbf16>, vector<112x512xbf16>, vector<16x512xf32> -> vector<16x512xf32>
    %33 = arith.maximumf %30, %32 : vector<16x512xf32>
    %34 = vector.extract_strided_slice %0 {offsets = [0, 160], sizes = [16, 96], strides = [1, 1]} : vector<16x256xbf16> to vector<16x96xbf16>
    %35 = vector.extract_strided_slice %1 {offsets = [0, 0], sizes = [96, 512], strides = [1, 1]} : vector<112x512xbf16> to vector<96x512xbf16>
    %cst_13 = arith.constant dense<0.000000e+00> : vector<16x512xf32>
    %36 = tpu.matmul %34, %35, %cst_13 {dimension_numbers = #tpu.dot_dimension_numbers<[1], [0], [0], [1], [0, 0, 1, 1], [], []>} : vector<16x96xbf16>, vector<96x512xbf16>, vector<16x512xf32> -> vector<16x512xf32>
    %c256_i32 = arith.constant 256 : i32
    %37 = vector.broadcast %c256_i32 : i32 to vector<16x512xi32>
    %38 = arith.cmpi slt, %2, %37 : vector<16x512xi32>
    %cst_14 = arith.constant 0xFF800000 : f32
    %39 = vector.broadcast %cst_14 : f32 to vector<16x512xf32>
    %40 = arith.select %38, %36, %39 : vector<16x512xi1>, vector<16x512xf32>
    %41 = arith.maximumf %33, %40 : vector<16x512xf32>
    %42 = vector.extract_strided_slice %0 {offsets = [0, 176], sizes = [16, 80], strides = [1, 1]} : vector<16x256xbf16> to vector<16x80xbf16>
    %43 = vector.extract_strided_slice %1 {offsets = [0, 0], sizes = [80, 512], strides = [1, 1]} : vector<112x512xbf16> to vector<80x512xbf16>
    %cst_15 = arith.constant dense<0.000000e+00> : vector<16x512xf32>
    %44 = tpu.matmul %42, %43, %cst_15 {dimension_numbers = #tpu.dot_dimension_numbers<[1], [0], [0], [1], [0, 0, 1, 1], [], []>} : vector<16x80xbf16>, vector<80x512xbf16>, vector<16x512xf32> -> vector<16x512xf32>
    %c128_i32 = arith.constant 128 : i32
    %45 = vector.broadcast %c128_i32 : i32 to vector<16x512xi32>
    %46 = arith.cmpi slt, %2, %45 : vector<16x512xi32>
    %cst_16 = arith.constant 0xFF800000 : f32
    %47 = vector.broadcast %cst_16 : f32 to vector<16x512xf32>
    %48 = arith.select %46, %44, %47 : vector<16x512xi1>, vector<16x512xf32>
    %49 = arith.maximumf %41, %48 : vector<16x512xf32>
    %50 = vector.extract_strided_slice %0 {offsets = [0, 192], sizes = [16, 64], strides = [1, 1]} : vector<16x256xbf16> to vector<16x64xbf16>
    %51 = vector.extract_strided_slice %1 {offsets = [0, 0], sizes = [64, 512], strides = [1, 1]} : vector<112x512xbf16> to vector<64x512xbf16>
    %cst_17 = arith.constant dense<0.000000e+00> : vector<16x512xf32>
    %52 = tpu.matmul %50, %51, %cst_17 {dimension_numbers = #tpu.dot_dimension_numbers<[1], [0], [0], [1], [0, 0, 1, 1], [], []>} : vector<16x64xbf16>, vector<64x512xbf16>, vector<16x512xf32> -> vector<16x512xf32>
    %c64_i32 = arith.constant 64 : i32
    %53 = vector.broadcast %c64_i32 : i32 to vector<16x512xi32>
    %54 = arith.cmpi slt, %2, %53 : vector<16x512xi32>
    %cst_18 = arith.constant 0xFF800000 : f32
    %55 = vector.broadcast %cst_18 : f32 to vector<16x512xf32>
    %56 = arith.select %54, %52, %55 : vector<16x512xi1>, vector<16x512xf32>
    %57 = arith.maximumf %49, %56 : vector<16x512xf32>
    %58 = vector.extract_strided_slice %0 {offsets = [0, 208], sizes = [16, 48], strides = [1, 1]} : vector<16x256xbf16> to vector<16x48xbf16>
    %59 = vector.extract_strided_slice %1 {offsets = [0, 0], sizes = [48, 512], strides = [1, 1]} : vector<112x512xbf16> to vector<48x512xbf16>
    %cst_19 = arith.constant dense<0.000000e+00> : vector<16x512xf32>
    %60 = tpu.matmul %58, %59, %cst_19 {dimension_numbers = #tpu.dot_dimension_numbers<[1], [0], [0], [1], [0, 0, 1, 1], [], []>} : vector<16x48xbf16>, vector<48x512xbf16>, vector<16x512xf32> -> vector<16x512xf32>
    %c32_i32 = arith.constant 32 : i32
    %61 = vector.broadcast %c32_i32 : i32 to vector<16x512xi32>
    %62 = arith.cmpi slt, %2, %61 : vector<16x512xi32>
    %cst_20 = arith.constant 0xFF800000 : f32
    %63 = vector.broadcast %cst_20 : f32 to vector<16x512xf32>
    %64 = arith.select %62, %60, %63 : vector<16x512xi1>, vector<16x512xf32>
    %65 = arith.maximumf %57, %64 : vector<16x512xf32>
    %66 = vector.extract_strided_slice %0 {offsets = [0, 224], sizes = [16, 32], strides = [1, 1]} : vector<16x256xbf16> to vector<16x32xbf16>
    %67 = vector.extract_strided_slice %1 {offsets = [0, 0], sizes = [32, 512], strides = [1, 1]} : vector<112x512xbf16> to vector<32x512xbf16>
    %cst_21 = arith.constant dense<0.000000e+00> : vector<16x512xf32>
    %68 = tpu.matmul %66, %67, %cst_21 {dimension_numbers = #tpu.dot_dimension_numbers<[1], [0], [0], [1], [0, 0, 1, 1], [], []>} : vector<16x32xbf16>, vector<32x512xbf16>, vector<16x512xf32> -> vector<16x512xf32>
    %c16_i32 = arith.constant 16 : i32
    %69 = vector.broadcast %c16_i32 : i32 to vector<16x512xi32>
    %70 = arith.cmpi slt, %2, %69 : vector<16x512xi32>
    %cst_22 = arith.constant 0xFF800000 : f32
    %71 = vector.broadcast %cst_22 : f32 to vector<16x512xf32>
    %72 = arith.select %70, %68, %71 : vector<16x512xi1>, vector<16x512xf32>
    %73 = arith.maximumf %65, %72 : vector<16x512xf32>
    %74 = vector.extract_strided_slice %0 {offsets = [0, 240], sizes = [16, 16], strides = [1, 1]} : vector<16x256xbf16> to vector<16x16xbf16>
    %75 = vector.extract_strided_slice %1 {offsets = [0, 0], sizes = [16, 512], strides = [1, 1]} : vector<112x512xbf16> to vector<16x512xbf16>
    %cst_23 = arith.constant dense<0.000000e+00> : vector<16x512xf32>
    %76 = tpu.matmul %74, %75, %cst_23 {dimension_numbers = #tpu.dot_dimension_numbers<[1], [0], [0], [1], [0, 0, 1, 1], [], []>} : vector<16x16xbf16>, vector<16x512xbf16>, vector<16x512xf32> -> vector<16x512xf32>
    %c8_i32 = arith.constant 8 : i32
    %77 = vector.broadcast %c8_i32 : i32 to vector<16x512xi32>
    %78 = arith.cmpi slt, %2, %77 : vector<16x512xi32>
    %cst_24 = arith.constant 0xFF800000 : f32
    %79 = vector.broadcast %cst_24 : f32 to vector<16x512xf32>
    %80 = arith.select %78, %76, %79 : vector<16x512xi1>, vector<16x512xf32>
    %81 = arith.maximumf %73, %80 : vector<16x512xf32>
    %c0_25 = arith.constant 0 : index
    %c0_26 = arith.constant 0 : index
    %82 = vector.load %arg3[%c0_25, %c0_26] : memref<1x512xf32, #tpu.memory_space<vmem>>, vector<1x512xf32>
    %83 = vector.broadcast %82 : vector<1x512xf32> to vector<16x512xf32>
    %84 = arith.addf %81, %83 : vector<16x512xf32>
    %cst_27 = arith.constant 0.000000e+00 : f32
    %85 = vector.broadcast %cst_27 : f32 to vector<16x512xf32>
    %86 = arith.maximumf %84, %85 : vector<16x512xf32>
    %c0_28 = arith.constant 0 : index
    %c0_29 = arith.constant 0 : index
    %87 = vector.load %arg4[%c0_28, %c0_29] : memref<16x512xf32, #tpu.memory_space<vmem>>, vector<16x512xf32>
    tpu.vector_store %arg4[%c0_28, %c0_29], %86 {strides = array<i32>} : memref<16x512xf32, #tpu.memory_space<vmem>>, vector<16x512xf32>,
    return
  }
  func.func @transform_0(%arg0: i32) -> (i32, i32) {
    %c0_i32 = arith.constant 0 : i32
    %c0_i32_0 = arith.constant 0 : i32
    return %arg0, %c0_i32 : i32, i32
  }
  func.func @transform_1(%arg0: i32) -> (i32, i32) {
    %c0_i32 = arith.constant 0 : i32
    %c0_i32_0 = arith.constant 0 : i32
    %c0_i32_1 = arith.constant 0 : i32
    return %c0_i32, %c0_i32_0 : i32, i32
  }
  func.func @transform_2(%arg0: i32) -> (i32, i32) {
    %c0_i32 = arith.constant 0 : i32
    %c0_i32_0 = arith.constant 0 : i32
    %c0_i32_1 = arith.constant 0 : i32
    return %c0_i32, %c0_i32_0 : i32, i32
  }
  func.func @transform_3(%arg0: i32) -> (i32, i32) {
    %c0_i32 = arith.constant 0 : i32
    %c0_i32_0 = arith.constant 0 : i32
    return %arg0, %c0_i32 : i32, i32
  }
}

</mosaic_0001>

<bundles_post_ra>
// kernel: tpu_custom_call.1
= control target key start
LH: loop header
LB: loop body
LE: loop exit
PB: predicated region body
PF: predicated region fallthrough
CT: control target
= control target key end

     0   :  { %8 = vsyncpa [#allocation3], 0  ;;  %s2865_s0 = inlined_call_operand.hbm [shape: bf16[16,256], index: 0, kind: input, shape index: {}]   ;;  %s2866_s1 = inlined_call_operand.hbm [shape: bf16[112,512], index: 1, kind: input, shape index: {}]   ;;  %s2867_s2 = inlined_call_operand.vmem [shape: f32[1,512], index: 2, kind: input, shape index: {}]   ;;  %s2868_s3 = inlined_call_operand.hbm [shape: f32[16,512], index: 3, kind: output, shape index: {}]  }
   0x1   :  { %9 = vsyncpa [#allocation6], 0 }
   0x2   :  { %10 = vsyncpa [#allocation4], 0  ;;  %s2160_s12 = smov [#allocation2]   ;;  %s2088_s16 = scalar_lea.hbm %s2865_s0, 256 }
   0x3   :  { %s16_s13 = sshll.u32 %s2160_s12, 4  ;;  %p2089_p0 = scmp.ne.s32.totalorder %s2865_s0, %s2088_s16  ;;  %s17_s13 = int_to_ptr.vmem [resolvable:$true] %s16_s13 }
   0x4   :  { %p2092_p1 = scmp.lt.u32.totalorder %s2088_s16, %s2865_s0 }
   0x6   :  { %p2094_p2 = pnand %p2092_p1, %p2089_p0 }
   0x8   :  { %2097 = shalt.err (!%p2094_p2)
}
   0x9   :  { %s2098_s21 = scalar_lea.vmem %s17_s13, 256  ;;  %p2103_p4 = scmp.lt.s32.totalorder %s17_s13, %s17_s13 }
   0xa   :  { %p2099_p3 = scmp.ne.s32.totalorder %s17_s13, %s2098_s21  ;;  %p2104_p5 = scmp.lt.s32.totalorder %s2098_s21, %s2098_s21 }
   0xc   :  { %p2105_p6 = por %p2104_p5, %p2103_p4 }
   0xe   :  { %p2106_p7 = pnand %p2105_p6, %p2099_p3 }
  0x10   :  { %2109 = shalt.err (!%p2106_p7)
}
  0x11   :  { %s2161_s22 = smov 128   ;;  %s2162_s23 = smov 8  }
  0x12   :  { %22 = dma.hbm_to_vmem [thread:$0]  %s2865_s0, 256, %s17_s13, [#allocation3], %s2161_s22, %s2161_s22, %s2162_s23  }
  0x13   :  { %s2163_s26 = smov [#allocation5]   ;;  %s2110_s30 = scalar_lea.hbm %s2866_s1, 3584 }
  0x14   :  { %s28_s27 = sshll.u32 %s2163_s26, 4  ;;  %p2111_p8 = scmp.ne.s32.totalorder %s2866_s1, %s2110_s30  ;;  %s29_s27 = int_to_ptr.vmem [resolvable:$true] %s28_s27 }
  0x15   :  { %p2114_p9 = scmp.lt.u32.totalorder %s2110_s30, %s2866_s1 }
  0x17   :  { %p2116_p10 = pnand %p2114_p9, %p2111_p8 }
  0x19   :  { %2119 = shalt.err (!%p2116_p10)
}
  0x1a   :  { %s2120_s8 = scalar_lea.vmem %s29_s27, 3584  ;;  %p2125_p12 = scmp.lt.s32.totalorder %s29_s27, %s29_s27 }
  0x1b   :  { %p2121_p11 = scmp.ne.s32.totalorder %s29_s27, %s2120_s8  ;;  %p2126_p13 = scmp.lt.s32.totalorder %s2120_s8, %s2120_s8 }
  0x1d   :  { %p2127_p0 = por %p2126_p13, %p2125_p12 }
  0x1f   :  { %p2128_p1 = pnand %p2127_p0, %p2121_p11 }
  0x21   :  { %2131 = shalt.err (!%p2128_p1)
}
  0x22   :  { %s2164_s0 = smov 256   ;;  %s2165_s9 = smov 16  }
  0x23   :  { %34 = dma.hbm_to_vmem [thread:$0]  %s2866_s1, 3584, %s29_s27, [#allocation6], %s2164_s0, %s2164_s0, %s2165_s9  }
  0x24   :  { %2154 = dma.done.wait [#allocation3], 256  }
  0x25   :  { %2155 = vsyncadd [#allocation3], 4294967040 }
  0x26   :  { %2156 = dma.done.wait [#allocation6], 3584  }
  0x27   :  { %2157 = vsyncadd [#allocation6], 4294963712  ;;  %v2166_v0 = vmov 0   ;;  %v2222_v1 = vld [vmem:[#allocation2] ss:$8 sps:$4 sm:$0xff]   ;;  %s2167_s12 = smov 112  }
  0x28   :  { %260 = vmatprep.mubr.bf16.mxu0 %v2166_v0  ;;  %303 = vmatprep.mubr.bf16.mxu1 %v2166_v0  ;;  %v2224_v2 = vld [vmem:[#allocation2 + $0x4] ss:$8 sps:$4 sm:$0xff]   ;;  %v2230_v4 = vld [vmem:[#allocation5] ss:$16 sps:$4 sm:$0xff]   ;;  %s2168_s1 = smov 96   ;;  %s2169_s13 = smov 80  }
  0x29   :  { %314 = vrot.lane.b32.xlu0 %v2222_v1, %s2167_s12  ;;  %v2228_v3 = vld [vmem:[#allocation5 + $0x4] ss:$16 sps:$4 sm:$0xff]   ;;  %418 = vrot.lane.b32.xlu1 %v2224_v2, %s2168_s1  ;;  %v2233_v5 = vld [vmem:[#allocation5 + $0xc] ss:$16 sps:$4 sm:$0xff]   ;;  %v2235_v6 = vld [vmem:[#allocation5 + $0x8] ss:$16 sps:$4 sm:$0xff]  }
  0x2a   :  { %228 = vmatprep.subr.bf16.mxu0 %v2228_v3  ;;  %v2238_v7 = vld [vmem:[#allocation5 + $0x24] ss:$16 sps:$4 sm:$0xff]   ;;  %271 = vmatprep.subr.bf16.mxu1 %v2233_v5  ;;  %v2242_v8 = vld [vmem:[#allocation5 + $0x20] ss:$16 sps:$4 sm:$0xff]   ;;  %v2246_v9 = vld [vmem:[#allocation5 + $0x2c] ss:$16 sps:$4 sm:$0xff]  }
  0x2b   :  { %229 = vmatpush1.bf16.msra.mxu0 %v2230_v4  ;;  %272 = vmatpush1.bf16.msra.mxu1 %v2235_v6  ;;  %v2248_v10 = vld [vmem:[#allocation5 + $0x28] ss:$16 sps:$4 sm:$0xff]   ;;  %v2252_v11 = vld [vmem:[#allocation5 + $0x44] ss:$16 sps:$4 sm:$0xff]   ;;  %v2255_v12 = vld [vmem:[#allocation5 + $0x4c] ss:$16 sps:$4 sm:$0xff]  }
  0x2c   :  { %230 = vmatprep.subr.bf16.mxu0 %v2238_v7  ;;  %273 = vmatprep.subr.bf16.mxu1 %v2246_v9  ;;  %v2258_v13 = vld [vmem:[#allocation5 + $0x40] ss:$16 sps:$4 sm:$0xff]   ;;  %v2262_v14 = vld [vmem:[#allocation5 + $0x48] ss:$16 sps:$4 sm:$0xff]   ;;  %v2264_v15 = vld [vmem:[#allocation5 + $0x64] ss:$16 sps:$4 sm:$0xff]  }
  0x2d   :  { %416 = vrot.lane.b32.xlu0 %v2222_v1, %s2168_s1  ;;  %519 = vrot.lane.b32.xlu1 %v2222_v1, %s2169_s13  ;;  %v2268_v16 = vld [vmem:[#allocation5 + $0x6c] ss:$16 sps:$4 sm:$0xff]   ;;  %s2170_s14 = smov 64   ;;  %v2272_v17 = vld [vmem:[#allocation5 + $0x60] ss:$16 sps:$4 sm:$0xff]   ;;  %s2171_s15 = smov 48  }
  0x2e   :  { %v2276_v18 = vld [vmem:[#allocation5 + $0x68] ss:$16 sps:$4 sm:$0xff]   ;;  %v2278_v19 = vld [vmem:[#allocation5 + $0x84] ss:$16 sps:$4 sm:$0xff]   ;;  %v2281_v20 = vld [vmem:[#allocation5 + $0x8c] ss:$16 sps:$4 sm:$0xff]  }
  0x2f   :  { %231 = vmatpush1.bf16.msra.mxu0 %v2242_v8  ;;  %274 = vmatpush1.bf16.msra.mxu1 %v2248_v10  ;;  %v2286_v21 = vld [vmem:[#allocation5 + $0x80] ss:$16 sps:$4 sm:$0xff]   ;;  %v2290_v22 = vld [vmem:[#allocation5 + $0x88] ss:$16 sps:$4 sm:$0xff]   ;;  %v2292_v23 = vld [vmem:[#allocation5 + $0xa4] ss:$16 sps:$4 sm:$0xff]  }
  0x30   :  { %232 = vmatprep.subr.bf16.mxu0 %v2252_v11  ;;  %275 = vmatprep.subr.bf16.mxu1 %v2255_v12  ;;  %v2295_v24 = vld [vmem:[#allocation5 + $0xac] ss:$16 sps:$4 sm:$0xff]   ;;  %s2172_s16 = smov 32   ;;  %v2301_v25 = vld [vmem:[#allocation5 + $0xa0] ss:$16 sps:$4 sm:$0xff]   ;;  %vm224_vm0 = vcmask 916480  }
  0x31   :  { %521 = vrot.lane.b32.xlu0 %v2224_v2, %s2169_s13  ;;  %622 = vrot.lane.b32.xlu1 %v2222_v1, %s2170_s14  ;;  %v2305_v26 = vld [vmem:[#allocation5 + $0xa8] ss:$16 sps:$4 sm:$0xff]   ;;  %v2307_v27 = vld [vmem:[#allocation5 + $0xc4] ss:$16 sps:$4 sm:$0xff]   ;;  %v2310_v28 = vld [vmem:[#allocation5 + $0xcc] ss:$16 sps:$4 sm:$0xff]  }
  0x32   :  { %v2317_v29 = vld [vmem:[#allocation5 + $0xc0] ss:$16 sps:$4 sm:$0xff]   ;;  %v2321_v30 = vld [vmem:[#allocation5 + $0xc8] ss:$16 sps:$4 sm:$0xff]   ;;  %vm420_vm1 = vcmask 785408   ;;  %vm523_vm2 = vcmask 654336  }
  0x33   :  { %233 = vmatpush1.bf16.msra.mxu0 %v2258_v13  ;;  %276 = vmatpush1.bf16.msra.mxu1 %v2262_v14  ;;  %vm626_vm3 = vcmask 523264   ;;  %vm729_vm4 = vcmask 392192   ;;  %vm832_vm5 = vcmask 261120   ;;  %vm935_vm6 = vcmask 130048  }
  0x34   :  { %234 = vmatprep.subr.bf16.mxu0 %v2264_v15  ;;  %277 = vmatprep.subr.bf16.mxu1 %v2268_v16 }
  0x35   :  { %624 = vrot.lane.b32.xlu0 %v2224_v2, %s2170_s14  ;;  %725 = vrot.lane.b32.xlu1 %v2222_v1, %s2171_s15 }
  0x37   :  { %235 = vmatpush1.bf16.msra.mxu0 %v2272_v17  ;;  %278 = vmatpush1.bf16.msra.mxu1 %v2276_v18 }
  0x38   :  { %236 = vmatprep.subr.bf16.mxu0 %v2278_v19  ;;  %279 = vmatprep.subr.bf16.mxu1 %v2281_v20 }
  0x39   :  { %727 = vrot.lane.b32.xlu0 %v2224_v2, %s2171_s15  ;;  %828 = vrot.lane.b32.xlu1 %v2222_v1, %s2172_s16 }
  0x3b   :  { %237 = vmatpush1.bf16.msra.mxu0 %v2286_v21  ;;  %280 = vmatpush1.bf16.msra.mxu1 %v2290_v22 }
  0x3c   :  { %238 = vmatprep.subr.bf16.mxu0 %v2292_v23  ;;  %281 = vmatprep.subr.bf16.mxu1 %v2295_v24 }
  0x3d   :  { %830 = vrot.lane.b32.xlu0 %v2224_v2, %s2172_s16  ;;  %931 = vrot.lane.b32.xlu1 %v2222_v1, %s2165_s9 }
  0x3f   :  { %239 = vmatpush1.bf16.msra.mxu0 %v2301_v25  ;;  %282 = vmatpush1.bf16.msra.mxu1 %v2305_v26 }
  0x40   :  { %240 = vmatprep.subr.bf16.mxu0 %v2307_v27  ;;  %283 = vmatprep.subr.bf16.mxu1 %v2310_v28 }
  0x41   :  { %933 = vrot.lane.b32.xlu0 %v2224_v2, %s2165_s9  ;;  %1131 = vrot.lane.b32.xlu1 %v2224_v2, %s2167_s12 }
  0x43   :  { %241 = vmatpush1.bf16.msra.mxu0 %v2317_v29  ;;  %284 = vmatpush1.bf16.msra.mxu1 %v2321_v30 }
  0x44   :  { %319 = vmatprep.subr.bf16.mxu0 %v2228_v3  ;;  %362 = vmatprep.subr.bf16.mxu1 %v2233_v5 }
  0x46   :  { %1983 = vmatmul.mubr.msk.bf16.vlgmr.msra.gmra.mrb[0].mxu0 %vm224_vm0, %v2222_v1  ;;  %1984 = vmatmul.mubr.msk.bf16.vlgmr.msra.gmra.mrb[0].mxu1 %vm224_vm0, %v2222_v1 }
  0x47   :  { %320 = vmatpush1.bf16.msra.mxu0 %v2230_v4  ;;  %363 = vmatpush1.bf16.msra.mxu1 %v2235_v6 }
  0x48   :  { %321 = vmatprep.subr.bf16.mxu0 %v2238_v7  ;;  %364 = vmatprep.subr.bf16.mxu1 %v2246_v9 }
  0x49   :  { %351 = vmatprep.mubr.bf16.mxu0 %v2166_v0  ;;  %394 = vmatprep.mubr.bf16.mxu1 %v2166_v0 }
  0x4b   :  { %322 = vmatpush1.bf16.msra.mxu0 %v2242_v8  ;;  %365 = vmatpush1.bf16.msra.mxu1 %v2248_v10 }
  0x4c   :  { %323 = vmatprep.subr.bf16.mxu0 %v2252_v11  ;;  %366 = vmatprep.subr.bf16.mxu1 %v2255_v12 }
  0x4f   :  { %324 = vmatpush1.bf16.msra.mxu0 %v2258_v13  ;;  %367 = vmatpush1.bf16.msra.mxu1 %v2262_v14 }
  0x50   :  { %325 = vmatprep.subr.bf16.mxu0 %v2264_v15  ;;  %368 = vmatprep.subr.bf16.mxu1 %v2268_v16 }
  0x53   :  { %326 = vmatpush1.bf16.msra.mxu0 %v2272_v17  ;;  %369 = vmatpush1.bf16.msra.mxu1 %v2276_v18 }
  0x54   :  { %327 = vmatprep.subr.bf16.mxu0 %v2278_v19  ;;  %370 = vmatprep.subr.bf16.mxu1 %v2281_v20 }
  0x57   :  { %328 = vmatpush1.bf16.msra.mxu0 %v2286_v21  ;;  %371 = vmatpush1.bf16.msra.mxu1 %v2290_v22 }
  0x58   :  { %329 = vmatprep.subr.bf16.mxu0 %v2292_v23  ;;  %372 = vmatprep.subr.bf16.mxu1 %v2295_v24 }
  0x5b   :  { %330 = vmatpush1.bf16.msra.mxu0 %v2301_v25  ;;  %373 = vmatpush1.bf16.msra.mxu1 %v2305_v26 }
  0x5c   :  { %331 = vmatprep.subr.bf16.mxu0 %v2307_v27  ;;  %374 = vmatprep.subr.bf16.mxu1 %v2310_v28 }
  0x5f   :  { %332 = vmatpush1.bf16.msra.mxu0 %v2317_v29  ;;  %375 = vmatpush1.bf16.msra.mxu1 %v2321_v30 }
  0x60   :  { %425 = vmatprep.subr.bf16.mxu0 %v2228_v3  ;;  %468 = vmatprep.subr.bf16.mxu1 %v2233_v5 }
  0x9b   :  { %v315_v31 = vpop.permute.xlu0 %314  ;;  %v2394_v32 = vpop.permute.xlu1 %418 }
  0x9c   :  { %1985 = vmatmul.mubr.msk.bf16.vlgmr.msra.gmra.mrb[4].mxu0 %vm224_vm0, %v315_v31  ;;  %1986 = vmatmul.mubr.msk.bf16.vlgmr.msra.gmra.mrb[4].mxu1 %vm224_vm0, %v315_v31 }
  0x9d   :  { %426 = vmatpush1.bf16.msra.mxu0 %v2230_v4  ;;  %469 = vmatpush1.bf16.msra.mxu1 %v2235_v6 }
  0x9e   :  { %427 = vmatprep.subr.bf16.mxu0 %v2238_v7  ;;  %470 = vmatprep.subr.bf16.mxu1 %v2246_v9 }
  0x9f   :  { %457 = vmatprep.mubr.bf16.mxu0 %v2166_v0  ;;  %500 = vmatprep.mubr.bf16.mxu1 %v2166_v0  ;;  %v417_v33 = vpop.permute.xlu0 %416  ;;  %v520_v35 = vpop.permute.xlu1 %519 }
  0xa0   :  { %v421_v34 = vsel %vm420_vm1, %v417_v33, %v2394_v32 }
  0xa1   :  { %428 = vmatpush1.bf16.msra.mxu0 %v2242_v8  ;;  %471 = vmatpush1.bf16.msra.mxu1 %v2248_v10 }
  0xa2   :  { %429 = vmatprep.subr.bf16.mxu0 %v2252_v11  ;;  %472 = vmatprep.subr.bf16.mxu1 %v2255_v12 }
  0xa3   :  { %v2430_v36 = vpop.permute.xlu0 %521  ;;  %v623_v38 = vpop.permute.xlu1 %622 }
  0xa4   :  { %v524_v37 = vsel %vm523_vm2, %v520_v35, %v2430_v36 }
  0xa5   :  { %430 = vmatpush1.bf16.msra.mxu0 %v2258_v13  ;;  %473 = vmatpush1.bf16.msra.mxu1 %v2262_v14 }
  0xa6   :  { %431 = vmatprep.subr.bf16.mxu0 %v2264_v15  ;;  %474 = vmatprep.subr.bf16.mxu1 %v2268_v16 }
  0xa7   :  { %v2466_v39 = vpop.permute.xlu0 %624  ;;  %v726_v41 = vpop.permute.xlu1 %725 }
  0xa8   :  { %v627_v40 = vsel %vm626_vm3, %v623_v38, %v2466_v39 }
  0xa9   :  { %432 = vmatpush1.bf16.msra.mxu0 %v2272_v17  ;;  %475 = vmatpush1.bf16.msra.mxu1 %v2276_v18 }
  0xaa   :  { %433 = vmatprep.subr.bf16.mxu0 %v2278_v19  ;;  %476 = vmatprep.subr.bf16.mxu1 %v2281_v20 }
  0xab   :  { %v2502_v42 = vpop.permute.xlu0 %727  ;;  %v829_v52 = vpop.permute.xlu1 %828 }
  0xac   :  { %v730_v43 = vsel %vm729_vm4, %v726_v41, %v2502_v42 }
  0xad   :  { %434 = vmatpush1.bf16.msra.mxu0 %v2286_v21  ;;  %477 = vmatpush1.bf16.msra.mxu1 %v2290_v22 }
  0xae   :  { %435 = vmatprep.subr.bf16.mxu0 %v2292_v23  ;;  %478 = vmatprep.subr.bf16.mxu1 %v2295_v24 }
  0xaf   :  { %v2554_v53 = vpop.permute.xlu0 %830  ;;  %v932_v55 = vpop.permute.xlu1 %931 }
  0xb0   :  { %v833_v54 = vsel %vm832_vm5, %v829_v52, %v2554_v53 }
  0xb1   :  { %436 = vmatpush1.bf16.msra.mxu0 %v2301_v25  ;;  %479 = vmatpush1.bf16.msra.mxu1 %v2305_v26 }
  0xb2   :  { %437 = vmatprep.subr.bf16.mxu0 %v2307_v27  ;;  %480 = vmatprep.subr.bf16.mxu1 %v2310_v28 }
  0xb3   :  { %v2590_v56 = vpop.permute.xlu0 %933 }
  0xb4   :  { %v936_v57 = vsel %vm935_vm6, %v932_v55, %v2590_v56 }
  0xb5   :  { %438 = vmatpush1.bf16.msra.mxu0 %v2317_v29  ;;  %481 = vmatpush1.bf16.msra.mxu1 %v2321_v30 }
  0xb6   :  { %528 = vmatprep.subr.bf16.mxu0 %v2228_v3  ;;  %571 = vmatprep.subr.bf16.mxu1 %v2233_v5 }
  0xb8   :  { %1988 = vmatmul.mubr.msk.bf16.vlgmr.msra.gmra.mrb[8].mxu0 %vm224_vm0, %v421_v34  ;;  %1989 = vmatmul.mubr.msk.bf16.vlgmr.msra.gmra.mrb[8].mxu1 %vm224_vm0, %v421_v34 }
  0xb9   :  { %529 = vmatpush1.bf16.msra.mxu0 %v2230_v4  ;;  %572 = vmatpush1.bf16.msra.mxu1 %v2235_v6 }
  0xba   :  { %530 = vmatprep.subr.bf16.mxu0 %v2238_v7  ;;  %573 = vmatprep.subr.bf16.mxu1 %v2246_v9 }
  0xbb   :  { %560 = vmatprep.mubr.bf16.mxu0 %v2166_v0  ;;  %603 = vmatprep.mubr.bf16.mxu1 %v2166_v0 }
  0xbd   :  { %531 = vmatpush1.bf16.msra.mxu0 %v2242_v8  ;;  %574 = vmatpush1.bf16.msra.mxu1 %v2248_v10 }
  0xbe   :  { %532 = vmatprep.subr.bf16.mxu0 %v2252_v11  ;;  %575 = vmatprep.subr.bf16.mxu1 %v2255_v12 }
  0xc1   :  { %533 = vmatpush1.bf16.msra.mxu0 %v2258_v13  ;;  %576 = vmatpush1.bf16.msra.mxu1 %v2262_v14 }
  0xc2   :  { %534 = vmatprep.subr.bf16.mxu0 %v2264_v15  ;;  %577 = vmatprep.subr.bf16.mxu1 %v2268_v16 }
  0xc5   :  { %535 = vmatpush1.bf16.msra.mxu0 %v2272_v17  ;;  %578 = vmatpush1.bf16.msra.mxu1 %v2276_v18 }
  0xc6   :  { %536 = vmatprep.subr.bf16.mxu0 %v2278_v19  ;;  %579 = vmatprep.subr.bf16.mxu1 %v2281_v20 }
  0xc9   :  { %537 = vmatpush1.bf16.msra.mxu0 %v2286_v21  ;;  %580 = vmatpush1.bf16.msra.mxu1 %v2290_v22 }
  0xca   :  { %538 = vmatprep.subr.bf16.mxu0 %v2292_v23  ;;  %581 = vmatprep.subr.bf16.mxu1 %v2295_v24 }
  0xcd   :  { %539 = vmatpush1.bf16.msra.mxu0 %v2301_v25  ;;  %582 = vmatpush1.bf16.msra.mxu1 %v2305_v26 }
  0xce   :  { %540 = vmatprep.subr.bf16.mxu0 %v2307_v27  ;;  %583 = vmatprep.subr.bf16.mxu1 %v2310_v28 }
  0xd1   :  { %541 = vmatpush1.bf16.msra.mxu0 %v2317_v29  ;;  %584 = vmatpush1.bf16.msra.mxu1 %v2321_v30 }
  0xd2   :  { %631 = vmatprep.subr.bf16.mxu0 %v2228_v3  ;;  %674 = vmatprep.subr.bf16.mxu1 %v2233_v5 }
  0xd4   :  { %1990 = vmatmul.mubr.msk.bf16.vlgmr.msra.gmra.mrb[12].mxu0 %vm224_vm0, %v524_v37  ;;  %1991 = vmatmul.mubr.msk.bf16.vlgmr.msra.gmra.mrb[12].mxu1 %vm224_vm0, %v524_v37 }
  0xd5   :  { %632 = vmatpush1.bf16.msra.mxu0 %v2230_v4  ;;  %675 = vmatpush1.bf16.msra.mxu1 %v2235_v6 }
  0xd6   :  { %633 = vmatprep.subr.bf16.mxu0 %v2238_v7  ;;  %676 = vmatprep.subr.bf16.mxu1 %v2246_v9 }
  0xd7   :  { %663 = vmatprep.mubr.bf16.mxu0 %v2166_v0  ;;  %706 = vmatprep.mubr.bf16.mxu1 %v2166_v0 }
  0xd9   :  { %634 = vmatpush1.bf16.msra.mxu0 %v2242_v8  ;;  %677 = vmatpush1.bf16.msra.mxu1 %v2248_v10 }
  0xda   :  { %635 = vmatprep.subr.bf16.mxu0 %v2252_v11  ;;  %678 = vmatprep.subr.bf16.mxu1 %v2255_v12 }
  0xdd   :  { %636 = vmatpush1.bf16.msra.mxu0 %v2258_v13  ;;  %679 = vmatpush1.bf16.msra.mxu1 %v2262_v14 }
  0xde   :  { %637 = vmatprep.subr.bf16.mxu0 %v2264_v15  ;;  %680 = vmatprep.subr.bf16.mxu1 %v2268_v16 }
  0xe1   :  { %638 = vmatpush1.bf16.msra.mxu0 %v2272_v17  ;;  %681 = vmatpush1.bf16.msra.mxu1 %v2276_v18 }
  0xe2   :  { %639 = vmatprep.subr.bf16.mxu0 %v2278_v19  ;;  %682 = vmatprep.subr.bf16.mxu1 %v2281_v20 }
  0xe5   :  { %640 = vmatpush1.bf16.msra.mxu0 %v2286_v21  ;;  %683 = vmatpush1.bf16.msra.mxu1 %v2290_v22 }
  0xe6   :  { %641 = vmatprep.subr.bf16.mxu0 %v2292_v23  ;;  %684 = vmatprep.subr.bf16.mxu1 %v2295_v24 }
  0xe9   :  { %642 = vmatpush1.bf16.msra.mxu0 %v2301_v25  ;;  %685 = vmatpush1.bf16.msra.mxu1 %v2305_v26 }
  0xea   :  { %643 = vmatprep.subr.bf16.mxu0 %v2307_v27  ;;  %686 = vmatprep.subr.bf16.mxu1 %v2310_v28 }
  0xed   :  { %644 = vmatpush1.bf16.msra.mxu0 %v2317_v29  ;;  %687 = vmatpush1.bf16.msra.mxu1 %v2321_v30 }
  0xee   :  { %734 = vmatprep.subr.bf16.mxu0 %v2228_v3  ;;  %777 = vmatprep.subr.bf16.mxu1 %v2233_v5 }
  0xf0   :  { %1992 = vmatmul.mubr.msk.bf16.vlgmr.msra.gmra.mrb[16].mxu0 %vm224_vm0, %v627_v40  ;;  %1993 = vmatmul.mubr.msk.bf16.vlgmr.msra.gmra.mrb[16].mxu1 %vm224_vm0, %v627_v40 }
  0xf1   :  { %735 = vmatpush1.bf16.msra.mxu0 %v2230_v4  ;;  %778 = vmatpush1.bf16.msra.mxu1 %v2235_v6 }
  0xf2   :  { %736 = vmatprep.subr.bf16.mxu0 %v2238_v7  ;;  %779 = vmatprep.subr.bf16.mxu1 %v2246_v9 }
  0xf3   :  { %766 = vmatprep.mubr.bf16.mxu0 %v2166_v0  ;;  %809 = vmatprep.mubr.bf16.mxu1 %v2166_v0 }
  0xf5   :  { %737 = vmatpush1.bf16.msra.mxu0 %v2242_v8  ;;  %780 = vmatpush1.bf16.msra.mxu1 %v2248_v10 }
  0xf6   :  { %738 = vmatprep.subr.bf16.mxu0 %v2252_v11  ;;  %781 = vmatprep.subr.bf16.mxu1 %v2255_v12 }
  0xf9   :  { %739 = vmatpush1.bf16.msra.mxu0 %v2258_v13  ;;  %782 = vmatpush1.bf16.msra.mxu1 %v2262_v14 }
  0xfa   :  { %740 = vmatprep.subr.bf16.mxu0 %v2264_v15  ;;  %783 = vmatprep.subr.bf16.mxu1 %v2268_v16 }
  0xfd   :  { %741 = vmatpush1.bf16.msra.mxu0 %v2272_v17  ;;  %784 = vmatpush1.bf16.msra.mxu1 %v2276_v18 }
  0xfe   :  { %742 = vmatprep.subr.bf16.mxu0 %v2278_v19  ;;  %785 = vmatprep.subr.bf16.mxu1 %v2281_v20 }
 0x101   :  { %743 = vmatpush1.bf16.msra.mxu0 %v2286_v21  ;;  %786 = vmatpush1.bf16.msra.mxu1 %v2290_v22 }
 0x102   :  { %744 = vmatprep.subr.bf16.mxu0 %v2292_v23  ;;  %787 = vmatprep.subr.bf16.mxu1 %v2295_v24 }
 0x105   :  { %745 = vmatpush1.bf16.msra.mxu0 %v2301_v25  ;;  %788 = vmatpush1.bf16.msra.mxu1 %v2305_v26 }
 0x106   :  { %746 = vmatprep.subr.bf16.mxu0 %v2307_v27  ;;  %789 = vmatprep.subr.bf16.mxu1 %v2310_v28 }
 0x109   :  { %747 = vmatpush1.bf16.msra.mxu0 %v2317_v29  ;;  %790 = vmatpush1.bf16.msra.mxu1 %v2321_v30 }
 0x10a   :  { %837 = vmatprep.subr.bf16.mxu0 %v2228_v3  ;;  %880 = vmatprep.subr.bf16.mxu1 %v2233_v5 }
 0x10c   :  { %1994 = vmatmul.mubr.msk.bf16.vlgmr.msra.gmra.mrb[20].mxu0 %vm224_vm0, %v730_v43  ;;  %1995 = vmatmul.mubr.msk.bf16.vlgmr.msra.gmra.mrb[20].mxu1 %vm224_vm0, %v730_v43  ;;  %v1132_v43 = vpop.permute.xlu1 %1131 }
 0x10d   :  { %838 = vmatpush1.bf16.msra.mxu0 %v2230_v4  ;;  %881 = vmatpush1.bf16.msra.mxu1 %v2235_v6 }
 0x10e   :  { %839 = vmatprep.subr.bf16.mxu0 %v2238_v7  ;;  %882 = vmatprep.subr.bf16.mxu1 %v2246_v9 }
 0x10f   :  { %869 = vmatprep.mubr.bf16.mxu0 %v2166_v0  ;;  %912 = vmatprep.mubr.bf16.mxu1 %v2166_v0 }
 0x111   :  { %840 = vmatpush1.bf16.msra.mxu0 %v2242_v8  ;;  %883 = vmatpush1.bf16.msra.mxu1 %v2248_v10 }
 0x112   :  { %841 = vmatprep.subr.bf16.mxu0 %v2252_v11  ;;  %884 = vmatprep.subr.bf16.mxu1 %v2255_v12 }
 0x115   :  { %842 = vmatpush1.bf16.msra.mxu0 %v2258_v13  ;;  %885 = vmatpush1.bf16.msra.mxu1 %v2262_v14 }
 0x116   :  { %843 = vmatprep.subr.bf16.mxu0 %v2264_v15  ;;  %886 = vmatprep.subr.bf16.mxu1 %v2268_v16 }
 0x119   :  { %844 = vmatpush1.bf16.msra.mxu0 %v2272_v17  ;;  %887 = vmatpush1.bf16.msra.mxu1 %v2276_v18  ;;  %v2530_v44 = vpop.f32.mrb[0].mxu0  ;;  %v2534_v46 = vpop.f32.mrb[0].mxu1 }
 0x11a   :  { %845 = vmatprep.subr.bf16.mxu0 %v2278_v19  ;;  %888 = vmatprep.subr.bf16.mxu1 %v2281_v20  ;;  %v2532_v45 = vpop.f32.mrb[1].mxu0  ;;  %v2538_v48 = vpop.f32.mrb[1].mxu1 }
 0x11b   :  { %v2536_v47 = vpop.f32.mrb[2].mxu0  ;;  %v2544_v50 = vpop.f32.mrb[2].mxu1 }
 0x11c   :  { %v2542_v49 = vpop.f32.mrb[3].mxu0  ;;  %v2548_v51 = vpop.f32.mrb[3].mxu1 }
 0x11d   :  { %846 = vmatpush1.bf16.msra.mxu0 %v2286_v21  ;;  %889 = vmatpush1.bf16.msra.mxu1 %v2290_v22 }
 0x11e   :  { %847 = vmatprep.subr.bf16.mxu0 %v2292_v23  ;;  %890 = vmatprep.subr.bf16.mxu1 %v2295_v24 }
 0x121   :  { %848 = vmatpush1.bf16.msra.mxu0 %v2301_v25  ;;  %891 = vmatpush1.bf16.msra.mxu1 %v2305_v26 }
 0x122   :  { %849 = vmatprep.subr.bf16.mxu0 %v2307_v27  ;;  %892 = vmatprep.subr.bf16.mxu1 %v2310_v28 }
 0x125   :  { %850 = vmatpush1.bf16.msra.mxu0 %v2317_v29  ;;  %893 = vmatpush1.bf16.msra.mxu1 %v2321_v30 }
 0x126   :  { %940 = vmatprep.subr.bf16.mxu0 %v2228_v3  ;;  %983 = vmatprep.subr.bf16.mxu1 %v2233_v5 }
 0x128   :  { %1996 = vmatmul.mubr.msk.bf16.vlgmr.msra.gmra.mrb[24].mxu0 %vm224_vm0, %v833_v54  ;;  %1997 = vmatmul.mubr.msk.bf16.vlgmr.msra.gmra.mrb[24].mxu1 %vm224_vm0, %v833_v54 }
 0x129   :  { %941 = vmatpush1.bf16.msra.mxu0 %v2230_v4  ;;  %984 = vmatpush1.bf16.msra.mxu1 %v2235_v6 }
 0x12a   :  { %942 = vmatprep.subr.bf16.mxu0 %v2238_v7  ;;  %985 = vmatprep.subr.bf16.mxu1 %v2246_v9 }
 0x12b   :  { %972 = vmatprep.mubr.bf16.mxu0 %v2166_v0  ;;  %1015 = vmatprep.mubr.bf16.mxu1 %v2166_v0 }
 0x12d   :  { %943 = vmatpush1.bf16.msra.mxu0 %v2242_v8  ;;  %986 = vmatpush1.bf16.msra.mxu1 %v2248_v10 }
 0x12e   :  { %944 = vmatprep.subr.bf16.mxu0 %v2252_v11  ;;  %987 = vmatprep.subr.bf16.mxu1 %v2255_v12 }
 0x131   :  { %945 = vmatpush1.bf16.msra.mxu0 %v2258_v13  ;;  %988 = vmatpush1.bf16.msra.mxu1 %v2262_v14 }
 0x132   :  { %946 = vmatprep.subr.bf16.mxu0 %v2264_v15  ;;  %989 = vmatprep.subr.bf16.mxu1 %v2268_v16 }
 0x135   :  { %947 = vmatpush1.bf16.msra.mxu0 %v2272_v17  ;;  %990 = vmatpush1.bf16.msra.mxu1 %v2276_v18 }
 0x136   :  { %948 = vmatprep.subr.bf16.mxu0 %v2278_v19  ;;  %991 = vmatprep.subr.bf16.mxu1 %v2281_v20 }
 0x139   :  { %949 = vmatpush1.bf16.msra.mxu0 %v2286_v21  ;;  %992 = vmatpush1.bf16.msra.mxu1 %v2290_v22 }
 0x13a   :  { %950 = vmatprep.subr.bf16.mxu0 %v2292_v23  ;;  %993 = vmatprep.subr.bf16.mxu1 %v2295_v24 }
 0x13d   :  { %951 = vmatpush1.bf16.msra.mxu0 %v2301_v25  ;;  %994 = vmatpush1.bf16.msra.mxu1 %v2305_v26 }
 0x13e   :  { %952 = vmatprep.subr.bf16.mxu0 %v2307_v27  ;;  %995 = vmatprep.subr.bf16.mxu1 %v2310_v28 }
 0x141   :  { %953 = vmatpush1.bf16.msra.mxu0 %v2317_v29  ;;  %996 = vmatpush1.bf16.msra.mxu1 %v2321_v30 }
 0x142   :  { %1037 = vmatprep.subr.bf16.mxu0 %v2228_v3  ;;  %1080 = vmatprep.subr.bf16.mxu1 %v2233_v5 }
 0x144   :  { %1998 = vmatmul.mubr.msk.bf16.vlgmr.msra.gmra.mrb[28].mxu0 %vm224_vm0, %v936_v57  ;;  %1999 = vmatmul.mubr.msk.bf16.vlgmr.msra.gmra.mrb[28].mxu1 %vm224_vm0, %v936_v57 }
 0x145   :  { %1038 = vmatpush1.bf16.msra.mxu0 %v2230_v4  ;;  %1081 = vmatpush1.bf16.msra.mxu1 %v2235_v6 }
 0x146   :  { %1039 = vmatprep.subr.bf16.mxu0 %v2238_v7  ;;  %1082 = vmatprep.subr.bf16.mxu1 %v2246_v9 }
 0x147   :  { %1069 = vmatprep.mubr.bf16.mxu0 %v2166_v0  ;;  %1112 = vmatprep.mubr.bf16.mxu1 %v2166_v0 }
 0x149   :  { %1040 = vmatpush1.bf16.msra.mxu0 %v2242_v8  ;;  %1083 = vmatpush1.bf16.msra.mxu1 %v2248_v10 }
 0x14a   :  { %1041 = vmatprep.subr.bf16.mxu0 %v2252_v11  ;;  %1084 = vmatprep.subr.bf16.mxu1 %v2255_v12 }
 0x14d   :  { %1042 = vmatpush1.bf16.msra.mxu0 %v2258_v13  ;;  %1085 = vmatpush1.bf16.msra.mxu1 %v2262_v14 }
 0x14e   :  { %1043 = vmatprep.subr.bf16.mxu0 %v2264_v15  ;;  %1086 = vmatprep.subr.bf16.mxu1 %v2268_v16 }
 0x151   :  { %1044 = vmatpush1.bf16.msra.mxu0 %v2272_v17  ;;  %1087 = vmatpush1.bf16.msra.mxu1 %v2276_v18 }
 0x152   :  { %1045 = vmatprep.subr.bf16.mxu0 %v2278_v19  ;;  %1088 = vmatprep.subr.bf16.mxu1 %v2281_v20 }
 0x155   :  { %1046 = vmatpush1.bf16.msra.mxu0 %v2286_v21  ;;  %1089 = vmatpush1.bf16.msra.mxu1 %v2290_v22 }
 0x156   :  { %1047 = vmatprep.subr.bf16.mxu0 %v2292_v23  ;;  %1090 = vmatprep.subr.bf16.mxu1 %v2295_v24 }
 0x159   :  { %1048 = vmatpush1.bf16.msra.mxu0 %v2301_v25  ;;  %1091 = vmatpush1.bf16.msra.mxu1 %v2305_v26 }
 0x15a   :  { %1049 = vmatprep.subr.bf16.mxu0 %v2307_v27  ;;  %1092 = vmatprep.subr.bf16.mxu1 %v2310_v28 }
 0x15d   :  { %1050 = vmatpush1.bf16.msra.mxu0 %v2317_v29  ;;  %1093 = vmatpush1.bf16.msra.mxu1 %v2321_v30 }
 0x15e   :  { %1136 = vmatprep.subr.bf16.mxu0 %v2228_v3  ;;  %1179 = vmatprep.subr.bf16.mxu1 %v2233_v5 }
 0x160   :  { %2000 = vmatmul.mubr.msk.bf16.vlgmr.msra.gmra.mrb[32].mxu0 %vm224_vm0, %v2224_v2  ;;  %2001 = vmatmul.mubr.msk.bf16.vlgmr.msra.gmra.mrb[32].mxu1 %vm224_vm0, %v2224_v2 }
 0x161   :  { %1137 = vmatpush1.bf16.msra.mxu0 %v2230_v4  ;;  %1180 = vmatpush1.bf16.msra.mxu1 %v2235_v6 }
 0x162   :  { %1138 = vmatprep.subr.bf16.mxu0 %v2238_v7  ;;  %1181 = vmatprep.subr.bf16.mxu1 %v2246_v9 }
 0x163   :  { %1168 = vmatprep.mubr.bf16.mxu0 %v2166_v0  ;;  %1211 = vmatprep.mubr.bf16.mxu1 %v2166_v0 }
 0x165   :  { %1139 = vmatpush1.bf16.msra.mxu0 %v2242_v8  ;;  %1182 = vmatpush1.bf16.msra.mxu1 %v2248_v10 }
 0x166   :  { %1140 = vmatprep.subr.bf16.mxu0 %v2252_v11  ;;  %1183 = vmatprep.subr.bf16.mxu1 %v2255_v12 }
 0x169   :  { %1141 = vmatpush1.bf16.msra.mxu0 %v2258_v13  ;;  %1184 = vmatpush1.bf16.msra.mxu1 %v2262_v14 }
 0x16a   :  { %1142 = vmatprep.subr.bf16.mxu0 %v2264_v15  ;;  %1185 = vmatprep.subr.bf16.mxu1 %v2268_v16 }
 0x16d   :  { %1143 = vmatpush1.bf16.msra.mxu0 %v2272_v17  ;;  %1186 = vmatpush1.bf16.msra.mxu1 %v2276_v18 }
 0x16e   :  { %1144 = vmatprep.subr.bf16.mxu0 %v2278_v19  ;;  %1187 = vmatprep.subr.bf16.mxu1 %v2281_v20 }
 0x16f   :  { %v353_v58 = vpop.f32.mrb[4].mxu0  ;;  %v396_v59 = vpop.f32.mrb[4].mxu1 }
 0x170   :  { %v405_v60 = vmax.f32 %v2530_v44, %v353_v58  ;;  %v407_v61 = vmax.f32 %v2534_v46, %v396_v59  ;;  %v355_v62 = vpop.f32.mrb[5].mxu0  ;;  %v398_v63 = vpop.f32.mrb[5].mxu1 }
 0x171   :  { %v406_v1 = vmax.f32 %v2532_v45, %v355_v62  ;;  %v408_v2 = vmax.f32 %v2538_v48, %v398_v63  ;;  %1145 = vmatpush1.bf16.msra.mxu0 %v2286_v21  ;;  %1188 = vmatpush1.bf16.msra.mxu1 %v2290_v22  ;;  %v357_v31 = vpop.f32.mrb[6].mxu0  ;;  %v400_v33 = vpop.f32.mrb[6].mxu1  ;;  %v2082_v62 = vld [vmem:[#allocation5 + $0xc] ss:$16 sps:$4 sm:$0xff]  }
 0x172   :  { %v409_v34 = vmax.f32 %v2536_v47, %v357_v31  ;;  %v411_v35 = vmax.f32 %v2544_v50, %v400_v33  ;;  %v359_v37 = vpop.f32.mrb[7].mxu0  ;;  %v402_v38 = vpop.f32.mrb[7].mxu1  ;;  %1146 = vmatprep.subr.bf16.mxu0 %v2292_v23  ;;  %1189 = vmatprep.subr.bf16.mxu1 %v2295_v24 }
 0x173   :  { %v410_v40 = vmax.f32 %v2542_v49, %v359_v37  ;;  %v412_v41 = vmax.f32 %v2548_v51, %v402_v38 }
 0x175   :  { %1147 = vmatpush1.bf16.msra.mxu0 %v2301_v25  ;;  %1190 = vmatpush1.bf16.msra.mxu1 %v2305_v26 }
 0x176   :  { %1148 = vmatprep.subr.bf16.mxu0 %v2307_v27  ;;  %1191 = vmatprep.subr.bf16.mxu1 %v2310_v28 }
 0x179   :  { %1149 = vmatpush1.bf16.msra.mxu0 %v2317_v29  ;;  %1192 = vmatpush1.bf16.msra.mxu1 %v2321_v30 }
 0x17a   :  { %1234 = vmatprep.subr.bf16.mxu0 %v2228_v3  ;;  %1277 = vmatprep.subr.bf16.mxu1 %v2233_v5 }
 0x17c   :  { %2002 = vmatmul.mubr.msk.bf16.vlgmr.msra.gmra.mrb[36].mxu0 %vm224_vm0, %v1132_v43  ;;  %2003 = vmatmul.mubr.msk.bf16.vlgmr.msra.gmra.mrb[36].mxu1 %vm224_vm0, %v1132_v43 }
 0x17d   :  { %1235 = vmatpush1.bf16.msra.mxu0 %v2230_v4  ;;  %1278 = vmatpush1.bf16.msra.mxu1 %v2235_v6 }
 0x17e   :  { %1236 = vmatprep.subr.bf16.mxu0 %v2238_v7  ;;  %1279 = vmatprep.subr.bf16.mxu1 %v2246_v9 }
 0x17f   :  { %1266 = vmatprep.mubr.bf16.mxu0 %v2166_v0  ;;  %1309 = vmatprep.mubr.bf16.mxu1 %v2166_v0 }
 0x181   :  { %1237 = vmatpush1.bf16.msra.mxu0 %v2242_v8  ;;  %1280 = vmatpush1.bf16.msra.mxu1 %v2248_v10 }
 0x182   :  { %1238 = vmatprep.subr.bf16.mxu0 %v2252_v11  ;;  %1281 = vmatprep.subr.bf16.mxu1 %v2255_v12 }
 0x185   :  { %1239 = vmatpush1.bf16.msra.mxu0 %v2258_v13  ;;  %1282 = vmatpush1.bf16.msra.mxu1 %v2262_v14 }
 0x186   :  { %1240 = vmatprep.subr.bf16.mxu0 %v2264_v15  ;;  %1283 = vmatprep.subr.bf16.mxu1 %v2268_v16 }
 0x189   :  { %1241 = vmatpush1.bf16.msra.mxu0 %v2272_v17  ;;  %1284 = vmatpush1.bf16.msra.mxu1 %v2276_v18 }
 0x18a   :  { %1242 = vmatprep.subr.bf16.mxu0 %v2278_v19  ;;  %1285 = vmatprep.subr.bf16.mxu1 %v2281_v20 }
 0x18b   :  { %v459_v27 = vpop.f32.mrb[8].mxu0  ;;  %v502_v28 = vpop.f32.mrb[8].mxu1 }
 0x18c   :  { %v2692_v29 = vmax.f32 %v405_v60, %v459_v27  ;;  %v2694_v30 = vmax.f32 %v407_v61, %v502_v28  ;;  %v461_v44 = vpop.f32.mrb[9].mxu0  ;;  %v504_v45 = vpop.f32.mrb[9].mxu1  ;;  %v2079_v60 = vld [vmem:[#allocation5 + $0x20] ss:$16 sps:$4 sm:$0xff]   ;;  %v2080_v61 = vld [vmem:[#allocation5 + $0x28] ss:$16 sps:$4 sm:$0xff]  }
 0x18d   :  { %v2696_v46 = vmax.f32 %v406_v1, %v461_v44  ;;  %v2698_v47 = vmax.f32 %v408_v2, %v504_v45  ;;  %v463_v48 = vpop.f32.mrb[10].mxu0  ;;  %v506_v49 = vpop.f32.mrb[10].mxu1  ;;  %1243 = vmatpush1.bf16.msra.mxu0 %v2286_v21  ;;  %1286 = vmatpush1.bf16.msra.mxu1 %v2290_v22 }
 0x18e   :  { %v2702_v50 = vmax.f32 %v409_v34, %v463_v48  ;;  %v2704_v51 = vmax.f32 %v411_v35, %v506_v49  ;;  %v465_v52 = vpop.f32.mrb[11].mxu0  ;;  %v508_v54 = vpop.f32.mrb[11].mxu1  ;;  %1244 = vmatprep.subr.bf16.mxu0 %v2292_v23  ;;  %1287 = vmatprep.subr.bf16.mxu1 %v2295_v24  ;;  %v2769_v23 = vld [vmem:[#allocation5 + $0x8] ss:$16 sps:$4 sm:$0xff]  }
 0x18f   :  { %v2708_v55 = vmax.f32 %v410_v40, %v465_v52  ;;  %v2710_v57 = vmax.f32 %v412_v41, %v508_v54 }
 0x191   :  { %1245 = vmatpush1.bf16.msra.mxu0 %v2301_v25  ;;  %1288 = vmatpush1.bf16.msra.mxu1 %v2305_v26 }
 0x192   :  { %1344 = vmatprep.subr.bf16.mxu0 %v2228_v3  ;;  %1387 = vmatprep.subr.bf16.mxu1 %v2233_v5 }
 0x194   :  { %2004 = vmatmul.mubr.msk.bf16.vlgmr.msra.gmra.mrb[40].mxu0 %vm420_vm1, %v2394_v32  ;;  %2005 = vmatmul.mubr.msk.bf16.vlgmr.msra.gmra.mrb[40].mxu1 %vm420_vm1, %v2394_v32 }
 0x195   :  { %1345 = vmatpush1.bf16.msra.mxu0 %v2230_v4  ;;  %1388 = vmatpush1.bf16.msra.mxu1 %v2235_v6 }
 0x196   :  { %1346 = vmatprep.subr.bf16.mxu0 %v2238_v7  ;;  %1389 = vmatprep.subr.bf16.mxu1 %v2246_v9 }
 0x197   :  { %1376 = vmatprep.mubr.bf16.mxu0 %v2166_v0  ;;  %1419 = vmatprep.mubr.bf16.mxu1 %v2166_v0 }
 0x199   :  { %1347 = vmatpush1.bf16.msra.mxu0 %v2242_v8  ;;  %1390 = vmatpush1.bf16.msra.mxu1 %v2248_v10 }
 0x19a   :  { %1348 = vmatprep.subr.bf16.mxu0 %v2252_v11  ;;  %1391 = vmatprep.subr.bf16.mxu1 %v2255_v12 }
 0x19d   :  { %1349 = vmatpush1.bf16.msra.mxu0 %v2258_v13  ;;  %1392 = vmatpush1.bf16.msra.mxu1 %v2262_v14 }
 0x19e   :  { %1350 = vmatprep.subr.bf16.mxu0 %v2264_v15  ;;  %1393 = vmatprep.subr.bf16.mxu1 %v2268_v16 }
 0x1a1   :  { %1351 = vmatpush1.bf16.msra.mxu0 %v2272_v17  ;;  %1394 = vmatpush1.bf16.msra.mxu1 %v2276_v18 }
 0x1a2   :  { %1352 = vmatprep.subr.bf16.mxu0 %v2278_v19  ;;  %1395 = vmatprep.subr.bf16.mxu1 %v2281_v20 }
 0x1a5   :  { %1353 = vmatpush1.bf16.msra.mxu0 %v2286_v21  ;;  %1396 = vmatpush1.bf16.msra.mxu1 %v2290_v22  ;;  %v2766_v22 = vld [vmem:[#allocation5] ss:$16 sps:$4 sm:$0xff]  }
 0x1a6   :  { %1454 = vmatprep.subr.bf16.mxu0 %v2228_v3  ;;  %1497 = vmatprep.subr.bf16.mxu1 %v2233_v5 }
 0x1a7   :  { %v2742_v4 = vpop.f32.mrb[12].mxu0  ;;  %v2744_v6 = vpop.f32.mrb[12].mxu1 }
 0x1a8   :  { %v614_v7 = vmax.f32 %v2692_v29, %v2742_v4  ;;  %v616_v8 = vmax.f32 %v2694_v30, %v2744_v6  ;;  %v2750_v10 = vpop.f32.mrb[13].mxu0  ;;  %v2752_v19 = vpop.f32.mrb[13].mxu1  ;;  %2006 = vmatmul.mubr.msk.bf16.vlgmr.msra.gmra.mrb[44].mxu0 %vm523_vm2, %v2430_v36  ;;  %2007 = vmatmul.mubr.msk.bf16.vlgmr.msra.gmra.mrb[44].mxu1 %vm523_vm2, %v2430_v36  ;;  %v2078_v36 = vld [vmem:[#allocation5 + $0x24] ss:$16 sps:$4 sm:$0xff]  }
 0x1a9   :  { %v615_v3 = vmax.f32 %v2696_v46, %v2750_v10  ;;  %v617_v5 = vmax.f32 %v2698_v47, %v2752_v19  ;;  %v2762_v20 = vpop.f32.mrb[14].mxu0  ;;  %v2764_v21 = vpop.f32.mrb[14].mxu1  ;;  %1455 = vmatpush1.bf16.msra.mxu0 %v2766_v22  ;;  %1498 = vmatpush1.bf16.msra.mxu1 %v2769_v23 }
 0x1aa   :  { %v618_v24 = vmax.f32 %v2702_v50, %v2762_v20  ;;  %v620_v25 = vmax.f32 %v2704_v51, %v2764_v21  ;;  %v2776_v26 = vpop.f32.mrb[15].mxu0  ;;  %v2778_v32 = vpop.f32.mrb[15].mxu1  ;;  %1456 = vmatprep.subr.bf16.mxu0 %v2078_v36  ;;  %1499 = vmatprep.subr.bf16.mxu1 %v2246_v9  ;;  %v2081_v9 = vld [vmem:[#allocation5 + $0x4] ss:$16 sps:$4 sm:$0xff]  }
 0x1ab   :  { %v619_v58 = vmax.f32 %v2708_v55, %v2776_v26  ;;  %v621_v59 = vmax.f32 %v2710_v57, %v2778_v32  ;;  %1486 = vmatprep.mubr.bf16.mxu0 %v2166_v0  ;;  %1529 = vmatprep.mubr.bf16.mxu1 %v2166_v0 }
 0x1ad   :  { %1457 = vmatpush1.bf16.msra.mxu0 %v2079_v60  ;;  %1500 = vmatpush1.bf16.msra.mxu1 %v2080_v61 }
 0x1ae   :  { %1458 = vmatprep.subr.bf16.mxu0 %v2252_v11  ;;  %1501 = vmatprep.subr.bf16.mxu1 %v2255_v12  ;;  %v2083_v11 = vld [vmem:[#allocation5 + $0x2c] ss:$16 sps:$4 sm:$0xff]   ;;  %v2084_v12 = vld [vmem:[#allocation5 + $0x44] ss:$16 sps:$4 sm:$0xff]  }
 0x1b1   :  { %1459 = vmatpush1.bf16.msra.mxu0 %v2258_v13  ;;  %1502 = vmatpush1.bf16.msra.mxu1 %v2262_v14  ;;  %v2085_v13 = vld [vmem:[#allocation5 + $0x4c] ss:$16 sps:$4 sm:$0xff]   ;;  %v2086_v14 = vld [vmem:[#allocation5 + $0x40] ss:$16 sps:$4 sm:$0xff]  }
 0x1b2   :  { %1460 = vmatprep.subr.bf16.mxu0 %v2264_v15  ;;  %1503 = vmatprep.subr.bf16.mxu1 %v2268_v16  ;;  %v2087_v15 = vld [vmem:[#allocation5 + $0x48] ss:$16 sps:$4 sm:$0xff]  }
 0x1b5   :  { %1461 = vmatpush1.bf16.msra.mxu0 %v2272_v17  ;;  %1504 = vmatpush1.bf16.msra.mxu1 %v2276_v18 }
 0x1b6   :  { %1564 = vmatprep.subr.bf16.mxu0 %v2081_v9  ;;  %1607 = vmatprep.subr.bf16.mxu1 %v2082_v62 }
 0x1b8   :  { %2008 = vmatmul.mubr.msk.bf16.vlgmr.msra.gmra.mrb[48].mxu0 %vm626_vm3, %v2466_v39  ;;  %2009 = vmatmul.mubr.msk.bf16.vlgmr.msra.gmra.mrb[48].mxu1 %vm626_vm3, %v2466_v39 }
 0x1b9   :  { %1565 = vmatpush1.bf16.msra.mxu0 %v2766_v22  ;;  %1608 = vmatpush1.bf16.msra.mxu1 %v2769_v23 }
 0x1ba   :  { %1566 = vmatprep.subr.bf16.mxu0 %v2078_v36  ;;  %1609 = vmatprep.subr.bf16.mxu1 %v2083_v11 }
 0x1bb   :  { %1596 = vmatprep.mubr.bf16.mxu0 %v2166_v0  ;;  %1639 = vmatprep.mubr.bf16.mxu1 %v2166_v0 }
 0x1bd   :  { %1567 = vmatpush1.bf16.msra.mxu0 %v2079_v60  ;;  %1610 = vmatpush1.bf16.msra.mxu1 %v2080_v61 }
 0x1be   :  { %1568 = vmatprep.subr.bf16.mxu0 %v2084_v12  ;;  %1611 = vmatprep.subr.bf16.mxu1 %v2085_v13 }
 0x1c1   :  { %1569 = vmatpush1.bf16.msra.mxu0 %v2086_v14  ;;  %1612 = vmatpush1.bf16.msra.mxu1 %v2087_v15 }
 0x1c2   :  { %1674 = vmatprep.subr.bf16.mxu0 %v2081_v9  ;;  %1717 = vmatprep.subr.bf16.mxu1 %v2082_v62 }
 0x1c3   :  { %v665_v16 = vpop.f32.mrb[16].mxu0  ;;  %v708_v17 = vpop.f32.mrb[16].mxu1 }
 0x1c4   :  { %v717_v18 = vmax.f32 %v614_v7, %v665_v16  ;;  %v719_v39 = vmax.f32 %v616_v8, %v708_v17  ;;  %v667_v63 = vpop.f32.mrb[17].mxu0  ;;  %v710_v1 = vpop.f32.mrb[17].mxu1  ;;  %2010 = vmatmul.mubr.msk.bf16.vlgmr.msra.gmra.mrb[52].mxu0 %vm729_vm4, %v2502_v42  ;;  %2011 = vmatmul.mubr.msk.bf16.vlgmr.msra.gmra.mrb[52].mxu1 %vm729_vm4, %v2502_v42 }
 0x1c5   :  { %v718_v2 = vmax.f32 %v615_v3, %v667_v63  ;;  %v720_v31 = vmax.f32 %v617_v5, %v710_v1  ;;  %v669_v33 = vpop.f32.mrb[18].mxu0  ;;  %v712_v34 = vpop.f32.mrb[18].mxu1  ;;  %1675 = vmatpush1.bf16.msra.mxu0 %v2766_v22  ;;  %1718 = vmatpush1.bf16.msra.mxu1 %v2769_v23 }
 0x1c6   :  { %v721_v35 = vmax.f32 %v618_v24, %v669_v33  ;;  %v723_v37 = vmax.f32 %v620_v25, %v712_v34  ;;  %v671_v38 = vpop.f32.mrb[19].mxu0  ;;  %v714_v40 = vpop.f32.mrb[19].mxu1  ;;  %1676 = vmatprep.subr.bf16.mxu0 %v2078_v36  ;;  %1719 = vmatprep.subr.bf16.mxu1 %v2083_v11 }
 0x1c7   :  { %v722_v42 = vmax.f32 %v619_v58, %v671_v38  ;;  %v724_v41 = vmax.f32 %v621_v59, %v714_v40  ;;  %1706 = vmatprep.mubr.bf16.mxu0 %v2166_v0  ;;  %1749 = vmatprep.mubr.bf16.mxu1 %v2166_v0 }
 0x1c9   :  { %1677 = vmatpush1.bf16.msra.mxu0 %v2079_v60  ;;  %1720 = vmatpush1.bf16.msra.mxu1 %v2080_v61 }
 0x1ca   :  { %1784 = vmatprep.subr.bf16.mxu0 %v2081_v9  ;;  %1827 = vmatprep.subr.bf16.mxu1 %v2082_v62 }
 0x1cc   :  { %2012 = vmatmul.mubr.msk.bf16.vlgmr.msra.gmra.mrb[56].mxu0 %vm832_vm5, %v2554_v53  ;;  %2013 = vmatmul.mubr.msk.bf16.vlgmr.msra.gmra.mrb[56].mxu1 %vm832_vm5, %v2554_v53 }
 0x1cd   :  { %1785 = vmatpush1.bf16.msra.mxu0 %v2766_v22  ;;  %1828 = vmatpush1.bf16.msra.mxu1 %v2769_v23 }
 0x1ce   :  { %1816 = vmatprep.mubr.bf16.mxu0 %v2166_v0  ;;  %1859 = vmatprep.mubr.bf16.mxu1 %v2166_v0 }
 0x1d4   :  { %2014 = vmatmul.mubr.msk.bf16.vlgmr.msra.gmra.mrb[60].mxu0 %vm935_vm6, %v2590_v56  ;;  %2015 = vmatmul.mubr.msk.bf16.vlgmr.msra.gmra.mrb[60].mxu1 %vm935_vm6, %v2590_v56 }
 0x1df   :  { %v768_v43 = vpop.f32.mrb[20].mxu0  ;;  %v811_v27 = vpop.f32.mrb[20].mxu1 }
 0x1e0   :  { %v820_v28 = vmax.f32 %v717_v18, %v768_v43  ;;  %v822_v29 = vmax.f32 %v719_v39, %v811_v27  ;;  %v770_v30 = vpop.f32.mrb[21].mxu0  ;;  %v813_v53 = vpop.f32.mrb[21].mxu1  ;;  %v74_v43 = vlaneseq }
 0x1e1   :  { %v821_v44 = vmax.f32 %v718_v2, %v770_v30  ;;  %v823_v45 = vmax.f32 %v720_v31, %v813_v53  ;;  %v772_v46 = vpop.f32.mrb[22].mxu0  ;;  %v815_v47 = vpop.f32.mrb[22].mxu1 }
 0x1e2   :  { %v824_v48 = vmax.f32 %v721_v35, %v772_v46  ;;  %v826_v49 = vmax.f32 %v723_v37, %v815_v47  ;;  %v774_v50 = vpop.f32.mrb[23].mxu0  ;;  %v817_v0 = vpop.f32.mrb[23].mxu1  ;;  %v2836_v27 = vshrl.u32 %v74_v43, 7 }
 0x1e3   :  { %v825_v51 = vmax.f32 %v722_v42, %v774_v50  ;;  %v827_v52 = vmax.f32 %v724_v41, %v817_v0 }
 0x1e4   :  { %v1906_v30 = vsub.s32 3, %v2836_v27 }
 0x1fb   :  { %v871_v54 = vpop.f32.mrb[24].mxu0  ;;  %v914_v55 = vpop.f32.mrb[24].mxu1 }
 0x1fc   :  { %v923_v57 = vmax.f32 %v820_v28, %v871_v54  ;;  %v925_v56 = vmax.f32 %v822_v29, %v914_v55  ;;  %v873_v4 = vpop.f32.mrb[25].mxu0  ;;  %v916_v6 = vpop.f32.mrb[25].mxu1  ;;  %v1902_v28 = vsub.s32 2, %v2836_v27  ;;  %v2842_v29 = vld [vmem:[%s2867_s2] sm:$0xf]  ;;  %s2173_s2 = smov [#allocation7]  }
 0x1fd   :  { %v924_v7 = vmax.f32 %v821_v44, %v873_v4  ;;  %v926_v8 = vmax.f32 %v823_v45, %v916_v6  ;;  %v875_v10 = vpop.f32.mrb[26].mxu0  ;;  %v918_v19 = vpop.f32.mrb[26].mxu1  ;;  %v1907_v46 = vrot.slane %v2842_v29, %v1906_v30  ;;  %s1941_s19 = sshll.u32 %s2173_s2, 4  ;;  %s1942_s19 = int_to_ptr.vmem [resolvable:$true] %s1941_s19 }
 0x1fe   :  { %v927_v3 = vmax.f32 %v824_v48, %v875_v10  ;;  %v929_v5 = vmax.f32 %v826_v49, %v918_v19  ;;  %v877_v20 = vpop.f32.mrb[27].mxu0  ;;  %v920_v21 = vpop.f32.mrb[27].mxu1  ;;  %v1903_v53 = vrot.slane %v2842_v29, %v1902_v28  ;;  %s2132_s20 = scalar_lea.vmem %s1942_s19, 1024  ;;  %p2137_p3 = scmp.lt.s32.totalorder %s1942_s19, %s1942_s19 }
 0x1ff   :  { %v928_v22 = vmax.f32 %v825_v51, %v877_v20  ;;  %v930_v23 = vmax.f32 %v827_v52, %v920_v21  ;;  %p2133_p2 = scmp.ne.s32.totalorder %s1942_s19, %s2132_s20  ;;  %p2138_p4 = scmp.lt.s32.totalorder %s2132_s20, %s2132_s20 }
 0x201   :  { %p2139_p5 = por %p2138_p4, %p2137_p3 }
 0x203   :  { %p2140_p6 = pnand %p2139_p5, %p2133_p2 }
 0x217   :  { %v974_v24 = vpop.f32.mrb[28].mxu0  ;;  %v1017_v25 = vpop.f32.mrb[28].mxu1 }
 0x218   :  { %v1026_v26 = vmax.f32 %v923_v57, %v974_v24  ;;  %v1028_v32 = vmax.f32 %v925_v56, %v1017_v25  ;;  %v976_v36 = vpop.f32.mrb[29].mxu0  ;;  %v1019_v58 = vpop.f32.mrb[29].mxu1 }
 0x219   :  { %v1027_v59 = vmax.f32 %v924_v7, %v976_v36  ;;  %v1029_v60 = vmax.f32 %v926_v8, %v1019_v58  ;;  %v978_v61 = vpop.f32.mrb[30].mxu0  ;;  %v1021_v9 = vpop.f32.mrb[30].mxu1 }
 0x21a   :  { %v1030_v62 = vmax.f32 %v927_v3, %v978_v61  ;;  %v1032_v11 = vmax.f32 %v929_v5, %v1021_v9  ;;  %v980_v12 = vpop.f32.mrb[31].mxu0  ;;  %v1023_v13 = vpop.f32.mrb[31].mxu1 }
 0x21b   :  { %v1031_v14 = vmax.f32 %v928_v22, %v980_v12  ;;  %v1033_v15 = vmax.f32 %v930_v23, %v1023_v13  ;;  %v1898_v23 = vsub.s32 1, %v2836_v27 }
 0x233   :  { %v1071_v16 = vpop.f32.mrb[32].mxu0  ;;  %v1114_v17 = vpop.f32.mrb[32].mxu1 }
 0x234   :  { %v1123_v18 = vmax.f32 %v1026_v26, %v1071_v16  ;;  %v1125_v39 = vmax.f32 %v1028_v32, %v1114_v17  ;;  %v1073_v63 = vpop.f32.mrb[33].mxu0  ;;  %v1116_v1 = vpop.f32.mrb[33].mxu1  ;;  %v1899_v26 = vrot.slane %v2842_v29, %v1898_v23 }
 0x235   :  { %v1124_v2 = vmax.f32 %v1027_v59, %v1073_v63  ;;  %v1126_v31 = vmax.f32 %v1029_v60, %v1116_v1  ;;  %v1075_v33 = vpop.f32.mrb[34].mxu0  ;;  %v1118_v34 = vpop.f32.mrb[34].mxu1 }
 0x236   :  { %v1127_v35 = vmax.f32 %v1030_v62, %v1075_v33  ;;  %v1129_v37 = vmax.f32 %v1032_v11, %v1118_v34  ;;  %v1077_v38 = vpop.f32.mrb[35].mxu0  ;;  %v1120_v40 = vpop.f32.mrb[35].mxu1 }
 0x237   :  { %v1128_v42 = vmax.f32 %v1031_v14, %v1077_v38  ;;  %v1130_v41 = vmax.f32 %v1033_v15, %v1120_v40 }
 0x24f   :  { %v1170_v44 = vpop.f32.mrb[36].mxu0  ;;  %v1213_v45 = vpop.f32.mrb[36].mxu1 }
 0x250   :  { %v1222_v47 = vmax.f32 %v1123_v18, %v1170_v44  ;;  %v1224_v48 = vmax.f32 %v1125_v39, %v1213_v45  ;;  %v1172_v49 = vpop.f32.mrb[37].mxu0  ;;  %v1215_v50 = vpop.f32.mrb[37].mxu1 }
 0x251   :  { %v1223_v0 = vmax.f32 %v1124_v2, %v1172_v49  ;;  %v1225_v51 = vmax.f32 %v1126_v31, %v1215_v50  ;;  %v1174_v52 = vpop.f32.mrb[38].mxu0  ;;  %v1217_v54 = vpop.f32.mrb[38].mxu1 }
 0x252   :  { %v1914_v55 = vadd.f32 %v1903_v53, %v1224_v48  ;;  %v1226_v57 = vmax.f32 %v1127_v35, %v1174_v52  ;;  %v1228_v56 = vmax.f32 %v1129_v37, %v1217_v54  ;;  %v1176_v4 = vpop.f32.mrb[39].mxu0  ;;  %v1219_v6 = vpop.f32.mrb[39].mxu1  ;;  %v75_v37 = vand.u32 127, %v74_v43 }
 0x253   :  { %v1915_v7 = vadd.f32 %v1907_v46, %v1225_v51  ;;  %v1227_v8 = vmax.f32 %v1128_v42, %v1176_v4  ;;  %v1229_v10 = vmax.f32 %v1130_v41, %v1219_v6 }
 0x254   :  { %v1922_v19 = vmax.f32 %v1914_v55, 0.0  ;;  %v1918_v3 = vadd.f32 %v1903_v53, %v1228_v56  ;;  %vm1540_vm7 = vcmp.lt.s32.totalorder %v75_v37, 64  ;;  %vm1650_vm8 = vcmp.lt.s32.totalorder %v75_v37, 32 }
 0x255   :  { %v1923_v5 = vmax.f32 %v1915_v7, 0.0  ;;  %v1919_v20 = vadd.f32 %v1907_v46, %v1229_v10  ;;  %vm1760_vm9 = vcmp.lt.s32.totalorder %v75_v37, 16  ;;  %vm1870_vm10 = vcmp.lt.s32.totalorder %v75_v37, 8 }
 0x256   :  { %1930 = vst [vmem:[#allocation7 + $0x10] sm:$0xff] %v1922_v19  ;;  %v1926_v21 = vmax.f32 %v1918_v3, 0.0 }
 0x257   :  { %1931 = vst [vmem:[#allocation7 + $0x18] sm:$0xff] %v1923_v5  ;;  %v1927_v22 = vmax.f32 %v1919_v20, 0.0 }
 0x258   :  { %1934 = vst [vmem:[#allocation7 + $0x30] sm:$0xff] %v1926_v21 }
 0x259   :  { %1935 = vst [vmem:[#allocation7 + $0x38] sm:$0xff] %v1927_v22 }
 0x267   :  { %v1268_v24 = vpop.f32.mrb[40].mxu0  ;;  %v1311_v25 = vpop.f32.mrb[40].mxu1 }
 0x268   :  { %v1332_v32 = vmax.f32 %v1222_v47, %v1268_v24  ;;  %v1270_v36 = vpop.f32.mrb[41].mxu0  ;;  %v1313_v58 = vpop.f32.mrb[41].mxu1 }
 0x269   :  { %v1333_v59 = vmax.f32 %v1223_v0, %v1270_v36  ;;  %v1272_v60 = vpop.f32.mrb[42].mxu0  ;;  %v1315_v61 = vpop.f32.mrb[42].mxu1 }
 0x26a   :  { %v1336_v9 = vmax.f32 %v1226_v57, %v1272_v60  ;;  %v1274_v62 = vpop.f32.mrb[43].mxu0  ;;  %v1317_v11 = vpop.f32.mrb[43].mxu1 }
 0x26b   :  { %v1913_v12 = vadd.f32 %v1899_v26, %v1333_v59  ;;  %v1337_v13 = vmax.f32 %v1227_v8, %v1274_v62 }
 0x26d   :  { %v1921_v14 = vmax.f32 %v1913_v12, 0.0  ;;  %v1917_v15 = vadd.f32 %v1899_v26, %v1337_v13  ;;  %v1894_v26 = vsub.s32 0, %v2836_v27 }
 0x26f   :  { %1929 = vst [vmem:[#allocation7 + $0x8] sm:$0xff] %v1921_v14  ;;  %v1925_v16 = vmax.f32 %v1917_v15, 0.0  ;;  %v1895_v36 = vrot.slane %v2842_v29, %v1894_v26 }
 0x271   :  { %1933 = vst [vmem:[#allocation7 + $0x28] sm:$0xff] %v1925_v16 }
 0x27b   :  { %v1378_v17 = vpop.f32.mrb[44].mxu0  ;;  %v1421_v18 = vpop.f32.mrb[44].mxu1 }
 0x27c   :  { %v1442_v39 = vmax.f32 %v1332_v32, %v1378_v17  ;;  %v1380_v63 = vpop.f32.mrb[45].mxu0  ;;  %v1423_v1 = vpop.f32.mrb[45].mxu1 }
 0x27d   :  { %v1382_v2 = vpop.f32.mrb[46].mxu0  ;;  %v1425_v31 = vpop.f32.mrb[46].mxu1 }
 0x27e   :  { %v1446_v33 = vmax.f32 %v1336_v9, %v1382_v2  ;;  %v1384_v34 = vpop.f32.mrb[47].mxu0  ;;  %v1427_v35 = vpop.f32.mrb[47].mxu1 }
 0x28b   :  { %v1488_v38 = vpop.f32.mrb[48].mxu0  ;;  %v1531_v40 = vpop.f32.mrb[48].mxu1 }
 0x28c   :  { %v1544_v42 = vsel %vm1540_vm7, %v1488_v38, -inf  ;;  %v1490_v41 = vpop.f32.mrb[49].mxu0  ;;  %v1533_v28 = vpop.f32.mrb[49].mxu1 }
 0x28d   :  { %v1552_v30 = vmax.f32 %v1442_v39, %v1544_v42  ;;  %v1492_v53 = vpop.f32.mrb[50].mxu0  ;;  %v1535_v44 = vpop.f32.mrb[50].mxu1 }
 0x28e   :  { %v1548_v45 = vsel %vm1540_vm7, %v1492_v53, -inf  ;;  %v1494_v46 = vpop.f32.mrb[51].mxu0  ;;  %v1537_v47 = vpop.f32.mrb[51].mxu1 }
 0x28f   :  { %v1556_v48 = vmax.f32 %v1446_v33, %v1548_v45 }
 0x297   :  { %v1598_v49 = vpop.f32.mrb[52].mxu0  ;;  %v1641_v50 = vpop.f32.mrb[52].mxu1 }
 0x298   :  { %v1654_v0 = vsel %vm1650_vm8, %v1598_v49, -inf  ;;  %v1600_v51 = vpop.f32.mrb[53].mxu0  ;;  %v1643_v52 = vpop.f32.mrb[53].mxu1 }
 0x299   :  { %v1662_v43 = vmax.f32 %v1552_v30, %v1654_v0  ;;  %v1602_v54 = vpop.f32.mrb[54].mxu0  ;;  %v1645_v55 = vpop.f32.mrb[54].mxu1 }
 0x29a   :  { %v1658_v57 = vsel %vm1650_vm8, %v1602_v54, -inf  ;;  %v1604_v56 = vpop.f32.mrb[55].mxu0  ;;  %v1647_v4 = vpop.f32.mrb[55].mxu1 }
 0x29b   :  { %v1666_v6 = vmax.f32 %v1556_v48, %v1658_v57 }
 0x29f   :  { %v1708_v7 = vpop.f32.mrb[56].mxu0  ;;  %v1751_v8 = vpop.f32.mrb[56].mxu1 }
 0x2a0   :  { %v1764_v10 = vsel %vm1760_vm9, %v1708_v7, -inf  ;;  %v1710_v19 = vpop.f32.mrb[57].mxu0  ;;  %v1753_v3 = vpop.f32.mrb[57].mxu1 }
 0x2a1   :  { %v1772_v5 = vmax.f32 %v1662_v43, %v1764_v10  ;;  %v1712_v20 = vpop.f32.mrb[58].mxu0  ;;  %v1755_v21 = vpop.f32.mrb[58].mxu1 }
 0x2a2   :  { %v1768_v22 = vsel %vm1760_vm9, %v1712_v20, -inf  ;;  %v1714_v23 = vpop.f32.mrb[59].mxu0  ;;  %v1757_v24 = vpop.f32.mrb[59].mxu1 }
 0x2a3   :  { %v1776_v25 = vmax.f32 %v1666_v6, %v1768_v22 }
 0x2a7   :  { %v1818_v32 = vpop.f32.mrb[60].mxu0  ;;  %v1861_v58 = vpop.f32.mrb[60].mxu1 }
 0x2a8   :  { %v1874_v59 = vsel %vm1870_vm10, %v1818_v32, -inf  ;;  %v1820_v60 = vpop.f32.mrb[61].mxu0  ;;  %v1863_v61 = vpop.f32.mrb[61].mxu1 }
 0x2a9   :  { %v1882_v9 = vmax.f32 %v1772_v5, %v1874_v59  ;;  %v1822_v62 = vpop.f32.mrb[62].mxu0  ;;  %v1865_v11 = vpop.f32.mrb[62].mxu1 }
 0x2aa   :  { %v1878_v12 = vsel %vm1870_vm10, %v1822_v62, -inf  ;;  %v1824_v13 = vpop.f32.mrb[63].mxu0  ;;  %v1867_v14 = vpop.f32.mrb[63].mxu1 }
 0x2ab   :  { %v1912_v15 = vadd.f32 %v1895_v36, %v1882_v9  ;;  %v1886_v16 = vmax.f32 %v1776_v25, %v1878_v12 }
 0x2ad   :  { %v1920_v17 = vmax.f32 %v1912_v15, 0.0  ;;  %v1916_v27 = vadd.f32 %v1895_v36, %v1886_v16 }
 0x2af   :  { %1928 = vst [vmem:[#allocation7] sm:$0xff] %v1920_v17  ;;  %v1924_v18 = vmax.f32 %v1916_v27, 0.0 }
 0x2b1   :  { %1932 = vst [vmem:[#allocation7 + $0x20] sm:$0xff] %v1924_v18 }
 0x2b2   :  { %2143 = shalt.err (!%p2140_p6)
}
 0x2b3   :  { %s2144_s23 = scalar_lea.hbm %s2868_s3, 1024 }
 0x2b4   :  { %p2145_p7 = scmp.ne.s32.totalorder %s2868_s3, %s2144_s23  ;;  %p2148_p8 = scmp.lt.u32.totalorder %s2144_s23, %s2868_s3 }
 0x2b6   :  { %p2150_p9 = pnand %p2148_p8, %p2145_p7 }
 0x2b8   :  { %2153 = shalt.err (!%p2150_p9)
}
 0x2b9   :  { %s2174_s28 = smov 512  }
 0x2ba   :  { %1947 = dma.vmem_to_hbm [thread:$0]  %s1942_s19, 1024, %s2868_s3, [#allocation4], %s2174_s28, %s2174_s28, %s2172_s16  }
 0x2bb   :  { %2158 = dma.done.wait [#allocation4], 1024  }
 0x2bc   :  { %2159 = vsyncadd [#allocation4], 4294966272 }
 0x2bd   :  { %1951 = vsyncpa [#allocation3], 1 }
 0x2be   :  { %1952 = vsyncpa [#allocation6], 1 }
 0x2bf   :  { %1953 = vsyncpa [#allocation4], 1 }

</bundles_post_ra>
